<compile_context>
chip_gen: v6e
topology: v6e:2x2x1
jax: 0.10.0
libtpu: 0.0.40
codegen_flags: <defaults>
</compile_context>

<pallas_src>
import functools

import jax
import jax.numpy as jnp
from jax import lax
from jax.experimental import pallas as pl
from jax.experimental.pallas import tpu as pltpu


def _mask_offsets(k):
    """All distinct nonzero (dh, dw) tap offsets used by the 3 dilated branches
    and the 3x3 fuse conv, in a deterministic order shared by wrapper & kernel."""
    offs = set()
    for d in range(3):
        dil = d + 1
        pad = dil * (k - 1) // 2
        for i in range(k):
            for j in range(k):
                offs.add((i * dil - pad, j * dil - pad))
    for i in range(3):
        for j in range(3):
            offs.add((i - 1, j - 1))
    offs.discard((0, 0))
    return sorted(offs)


def _dgroup_kernel(x_ref, mask_ref, wall_ref, ball_ref, ws_ref, bs_ref,
                   o_ref, patch_ref, *, W, HW, cp, out_c, k, nb, offsets):
    wp = nb * HW

    # Batched image slab: zero-padded channels on sublanes (cp = 8), the nb
    # images concatenated on the lane axis (per-image blocks are 128-aligned).
    x = jnp.concatenate([x_ref[n].astype(jnp.float32) for n in range(nb)],
                        axis=-1)                                   # (cp, wp)

    def tap(val, dh, dw):
        # val shifted so column q reads pixel (h+dh, w+dw) of its own image,
        # with zero padding at image borders: circular roll (XLU) + per-offset
        # validity mask (VPU).  In-bounds lanes never wrap across images; all
        # out-of-bounds / wrapped lanes are exactly the masked ones.
        s = dh * W + dw
        if s == 0:
            return val
        r = offsets.index((dh, dw))
        rolled = pltpu.roll(val, shift=(-s) % wp, axis=1)
        return rolled * mask_ref[r:r + 1, :]

    # ---- im2col for all 3 dilated branches: one aligned (8, wp) store per tap
    for d in range(3):
        dil = d + 1
        pad = dil * (k - 1) // 2
        for i in range(k):
            for j in range(k):
                t = (d * k + i) * k + j
                patch_ref[t * cp:(t + 1) * cp, :] = tap(x, i * dil - pad,
                                                        j * dil - pad)

    # ---- all three BN-folded conv branches in ONE MXU matmul, + bias, ReLU --
    cat = jnp.dot(wall_ref[...], patch_ref[...],
                  preferred_element_type=jnp.float32)
    cat = jnp.maximum(cat + ball_ref[...], 0.0)                    # (3*dim, wp)

    # ---- 3x3 fuse conv: 9 accumulated matvecs on the in-register `cat` ------
    acc = jnp.zeros((out_c, wp), jnp.float32) + bs_ref[...]
    for i in range(3):
        for j in range(3):
            t = i * 3 + j
            acc = acc + jnp.dot(ws_ref[t * out_c:(t + 1) * out_c, :],
                                tap(cat, i - 1, j - 1),
                                preferred_element_type=jnp.float32)

    out = jnp.tanh(acc)                                            # (out_c, wp)
    for n in range(nb):
        o_ref[n] = out[:, n * HW:(n + 1) * HW].astype(o_ref.dtype)


def make_dgroup_forward(params, *, H, W, k, N, images_per_block=None, eps=1e-5):
    """One-time prepare step: fold BN, build block-diagonal / tap weights and
    the validity masks, set up the pallas_call.  Returns a jitted forward fn."""
    dim = params["wd_oihw"].shape[1]
    in_c = params["wd_oihw"].shape[2]
    out_c = params["ws_oihw"].shape[0]
    HW = H * W
    cp = -(-in_c // 8) * 8                    # channels padded to sublane tile

    # -- how many images share one grid step (lane-axis batching) -------------
    if images_per_block is None:
        cap = max(1, 4096 // HW)              # bound patch scratch / lane width
        nb = min(N, cap)
        while N % nb:
            nb -= 1
    else:
        nb = images_per_block
        assert N % nb == 0, (N, nb)
    wp = nb * HW

    # -- fold BatchNorm (eval) into conv weight + single per-channel bias -----
    scale = params["gamma"] / jnp.sqrt(params["var"] + eps)            # (3, dim)
    shift = params["beta"] - params["mean"] * scale
    wfold = params["wd_oihw"] * scale[:, :, None, None, None]          # (3,dim,in_c,k,k)
    ball = (scale * params["bd"] + shift).reshape(3 * dim, 1).astype(jnp.float32)

    # branch weights -> block-diagonal (3*dim, 3*k*k*cp); row order (d, i, j, c)
    wb = jnp.transpose(wfold, (0, 1, 3, 4, 2))                         # (3,dim,k,k,in_c)
    wb = jnp.pad(wb, ((0, 0), (0, 0), (0, 0), (0, 0), (0, cp - in_c)))
    wb = wb.reshape(3, dim, k * k * cp)
    wall = jax.scipy.linalg.block_diag(wb[0], wb[1], wb[2]).astype(jnp.float32)

    # fuse-conv weights -> one (out_c, 3*dim) row block per tap, (i, j)-major
    ws_mat = jnp.transpose(params["ws_oihw"], (2, 3, 0, 1)).reshape(
        9 * out_c, 3 * dim).astype(jnp.float32)
    bs = params["bs"].reshape(out_c, 1).astype(jnp.float32)

    # per-(dh, dw) validity masks over the batched lane axis
    offsets = _mask_offsets(k)
    p = jnp.arange(HW, dtype=jnp.int32)
    h, w = p // W, p % W
    rows = [((h + dh >= 0) & (h + dh < H) & (w + dw >= 0) & (w + dw < W))
            .astype(jnp.float32) for (dh, dw) in offsets]
    mask = jnp.tile(jnp.stack(rows), (1, nb))                          # (n_off, wp)

    kernel = functools.partial(_dgroup_kernel, W=W, HW=HW, cp=cp, out_c=out_c,
                               k=k, nb=nb, offsets=tuple(offsets))

    grid_spec = pltpu.PrefetchScalarGridSpec(
        num_scalar_prefetch=0,
        grid=(N // nb,),
        in_specs=[
            pl.BlockSpec((nb, cp, HW), lambda n: (n, 0, 0)),
            pl.BlockSpec(mask.shape, lambda n: (0, 0)),
            pl.BlockSpec(wall.shape, lambda n: (0, 0)),
            pl.BlockSpec(ball.shape, lambda n: (0, 0)),
            pl.BlockSpec(ws_mat.shape, lambda n: (0, 0)),
            pl.BlockSpec(bs.shape, lambda n: (0, 0)),
        ],
        out_specs=pl.BlockSpec((nb, out_c, HW), lambda n: (n, 0, 0)),
        # only scratch left: the im2col patch for the branch matmul (~432*wp B).
        scratch_shapes=[pltpu.VMEM((3 * k * k * cp, wp), jnp.float32)],
    )

    call = pl.pallas_call(
        kernel,
        out_shape=jax.ShapeDtypeStruct((N, out_c, HW), jnp.float32),
        grid_spec=grid_spec,
        compiler_params=pltpu.CompilerParams(
            dimension_semantics=("parallel",)),
    )

    @jax.jit
    def forward(x_nchw):
        x = x_nchw.astype(jnp.float32).reshape(N, in_c, HW)
        x = jnp.pad(x, ((0, 0), (0, cp - in_c), (0, 0)))   # channels -> 8
        y = call(x, mask, wall, ball, ws_mat, bs)
        return y.reshape(N, out_c, H, W)

    return forward


def dgroup_reference(x_nchw, params, *, k):
    """Pure-JAX reference (lax convs) matching PyTorch semantics."""
    eps = 1e-5
    branches = []
    for d in range(3):
        dil = d + 1
        pad = dil * (k - 1) // 2
        y = lax.conv_general_dilated(
            x_nchw, params["wd_oihw"][d], window_strides=(1, 1),
            padding=[(pad, pad), (pad, pad)], rhs_dilation=(dil, dil),
            dimension_numbers=("NCHW", "OIHW", "NCHW"))
        y = y + params["bd"][d][None, :, None, None]
        sc = params["gamma"][d] / jnp.sqrt(params["var"][d] + eps)
        sh = params["beta"][d] - params["mean"][d] * sc
        y = y * sc[None, :, None, None] + sh[None, :, None, None]
        branches.append(jnp.maximum(y, 0.0))
    cat = jnp.concatenate(branches, axis=1)
    ys = lax.conv_general_dilated(
        cat, params["ws_oihw"], window_strides=(1, 1),
        padding=[(1, 1), (1, 1)],
        dimension_numbers=("NCHW", "OIHW", "NCHW"))
    ys = ys + params["bs"][None, :, None, None]
    return jnp.tanh(ys)


if __name__ == "__main__":
    # small shapes: DGroup(in_c=4, out_c=1, dim=8, k_size=3, use_bn=True)
    N, in_c, H, W = 2, 4, 16, 16
    dim, out_c, k = 8, 1, 3

    key = jax.random.PRNGKey(0)
    ks = jax.random.split(key, 10)
    params = {
        "wd_oihw": 0.1 * jax.random.normal(ks[0], (3, dim, in_c, k, k), jnp.float32),
        "bd":      0.1 * jax.random.normal(ks[1], (3, dim), jnp.float32),
        "gamma":   1.0 + 0.1 * jax.random.normal(ks[2], (3, dim), jnp.float32),
        "beta":    0.1 * jax.random.normal(ks[3], (3, dim), jnp.float32),
        "mean":    0.1 * jax.random.normal(ks[4], (3, dim), jnp.float32),
        "var":     1.0 + 0.1 * jnp.abs(jax.random.normal(ks[5], (3, dim), jnp.float32)),
        "ws_oihw": 0.1 * jax.random.normal(ks[6], (out_c, 3 * dim, 3, 3), jnp.float32),
        "bs":      0.1 * jax.random.normal(ks[7], (out_c,), jnp.float32),
    }
    x = jax.random.normal(ks[8], (N, in_c, H, W), jnp.float32)

    # one-time prepare (BN fold, weight layout, masks) + jitted kernel-only forward
    dgroup_forward = make_dgroup_forward(params, H=H, W=W, k=k, N=N)

    out = jax.block_until_ready(dgroup_forward(x))
    ref = jax.block_until_ready(dgroup_reference(x, params, k=k))

    assert out.shape == (N, out_c, H, W), out.shape
    err = float(jnp.max(jnp.abs(out - ref)))
    assert err < 1e-4, err
    print("KERNEL_OK")
</pallas_src>

<mosaic_0001>
module attributes {stable_mosaic.version = 11 : i64} {
  func.func @_dgroup_kernel(%arg0: i32, %arg1: memref<2x8x256xf32, #tpu.memory_space<vmem>>, %arg2: memref<24x512xf32, #tpu.memory_space<vmem>>, %arg3: memref<24x216xf32, #tpu.memory_space<vmem>>, %arg4: memref<24x1xf32, #tpu.memory_space<vmem>>, %arg5: memref<9x24xf32, #tpu.memory_space<vmem>>, %arg6: memref<1x1xf32, #tpu.memory_space<vmem>>, %arg7: memref<2x1x256xf32, #tpu.memory_space<vmem>>, %arg8: memref<216x512xf32, #tpu.memory_space<vmem>>) attributes {dimension_semantics = [#tpu.dimension_semantics<parallel>], iteration_bounds = array<i64: 1>, scalar_prefetch = 0 : i64, scratch_operands = 1 : i64, tpu.core_type = #tpu.core_type<tc>, window_params = [{transform_indices = @transform_0, window_bounds = array<i64: 2, 8, 256>}, {pipeline_mode = #tpu.pipeline_mode<synchronous>, transform_indices = @transform_1, window_bounds = array<i64: 24, 512>}, {pipeline_mode = #tpu.pipeline_mode<synchronous>, transform_indices = @transform_2, window_bounds = array<i64: 24, 216>}, {pipeline_mode = #tpu.pipeline_mode<synchronous>, transform_indices = @transform_3, window_bounds = array<i64: 24, 1>}, {pipeline_mode = #tpu.pipeline_mode<synchronous>, transform_indices = @transform_4, window_bounds = array<i64: 9, 24>}, {pipeline_mode = #tpu.pipeline_mode<synchronous>, transform_indices = @transform_5, window_bounds = array<i64: 1, 1>}, {transform_indices = @transform_6, window_bounds = array<i64: 2, 1, 256>}]} {
    %c0 = arith.constant 0 : index
    %c0_0 = arith.constant 0 : index
    %c0_1 = arith.constant 0 : index
    %0 = vector.load %arg1[%c0, %c0_0, %c0_1] : memref<2x8x256xf32, #tpu.memory_space<vmem>>, vector<1x8x256xf32>
    %1 = vector.shape_cast %0 : vector<1x8x256xf32> to vector<8x256xf32>
    %c1 = arith.constant 1 : index
    %c0_2 = arith.constant 0 : index
    %c0_3 = arith.constant 0 : index
    %2 = vector.load %arg1[%c1, %c0_2, %c0_3] : memref<2x8x256xf32, #tpu.memory_space<vmem>>, vector<1x8x256xf32>
    %3 = vector.shape_cast %2 : vector<1x8x256xf32> to vector<8x256xf32>
    %4 = tpu.concatenate %1, %3 in 1 : vector<8x256xf32>, vector<8x256xf32> -> vector<8x512xf32>
    %c17_i32 = arith.constant 17 : i32
    %5 = tpu.dynamic_rotate %4 by %c17_i32 dim 1 : vector<8x512xf32>, i32 -> vector<8x512xf32>
    %c6 = arith.constant 6 : index
    %c0_4 = arith.constant 0 : index
    %6 = vector.load %arg2[%c6, %c0_4] : memref<24x512xf32, #tpu.memory_space<vmem>>, vector<1x512xf32>
    %7 = vector.broadcast %6 : vector<1x512xf32> to vector<8x512xf32>
    %8 = arith.mulf %5, %7 : vector<8x512xf32>
    %c0_5 = arith.constant 0 : index
    %c0_6 = arith.constant 0 : index
    %9 = vector.load %arg8[%c0_5, %c0_6] : memref<216x512xf32, #tpu.memory_space<vmem>>, vector<8x512xf32>
    tpu.vector_store %arg8[%c0_5, %c0_6], %8 {strides = array<i32>} : memref<216x512xf32, #tpu.memory_space<vmem>>, vector<8x512xf32>,
    %c16_i32 = arith.constant 16 : i32
    %10 = tpu.dynamic_rotate %4 by %c16_i32 dim 1 : vector<8x512xf32>, i32 -> vector<8x512xf32>
    %c7 = arith.constant 7 : index
    %c0_7 = arith.constant 0 : index
    %11 = vector.load %arg2[%c7, %c0_7] : memref<24x512xf32, #tpu.memory_space<vmem>>, vector<1x512xf32>
    %12 = vector.broadcast %11 : vector<1x512xf32> to vector<8x512xf32>
    %13 = arith.mulf %10, %12 : vector<8x512xf32>
    %c8 = arith.constant 8 : index
    %c0_8 = arith.constant 0 : index
    %14 = vector.load %arg8[%c8, %c0_8] : memref<216x512xf32, #tpu.memory_space<vmem>>, vector<8x512xf32>
    tpu.vector_store %arg8[%c8, %c0_8], %13 {strides = array<i32>} : memref<216x512xf32, #tpu.memory_space<vmem>>, vector<8x512xf32>,
    %c15_i32 = arith.constant 15 : i32
    %15 = tpu.dynamic_rotate %4 by %c15_i32 dim 1 : vector<8x512xf32>, i32 -> vector<8x512xf32>
    %c8_9 = arith.constant 8 : index
    %c0_10 = arith.constant 0 : index
    %16 = vector.load %arg2[%c8_9, %c0_10] : memref<24x512xf32, #tpu.memory_space<vmem>>, vector<1x512xf32>
    %17 = vector.broadcast %16 : vector<1x512xf32> to vector<8x512xf32>
    %18 = arith.mulf %15, %17 : vector<8x512xf32>
    %c16 = arith.constant 16 : index
    %c0_11 = arith.constant 0 : index
    %19 = vector.load %arg8[%c16, %c0_11] : memref<216x512xf32, #tpu.memory_space<vmem>>, vector<8x512xf32>
    tpu.vector_store %arg8[%c16, %c0_11], %18 {strides = array<i32>} : memref<216x512xf32, #tpu.memory_space<vmem>>, vector<8x512xf32>,
    %c1_i32 = arith.constant 1 : i32
    %20 = tpu.dynamic_rotate %4 by %c1_i32 dim 1 : vector<8x512xf32>, i32 -> vector<8x512xf32>
    %c11 = arith.constant 11 : index
    %c0_12 = arith.constant 0 : index
    %21 = vector.load %arg2[%c11, %c0_12] : memref<24x512xf32, #tpu.memory_space<vmem>>, vector<1x512xf32>
    %22 = vector.broadcast %21 : vector<1x512xf32> to vector<8x512xf32>
    %23 = arith.mulf %20, %22 : vector<8x512xf32>
    %c24 = arith.constant 24 : index
    %c0_13 = arith.constant 0 : index
    %24 = vector.load %arg8[%c24, %c0_13] : memref<216x512xf32, #tpu.memory_space<vmem>>, vector<8x512xf32>
    tpu.vector_store %arg8[%c24, %c0_13], %23 {strides = array<i32>} : memref<216x512xf32, #tpu.memory_space<vmem>>, vector<8x512xf32>,
    %c32 = arith.constant 32 : index
    %c0_14 = arith.constant 0 : index
    %25 = vector.load %arg8[%c32, %c0_14] : memref<216x512xf32, #tpu.memory_space<vmem>>, vector<8x512xf32>
    tpu.vector_store %arg8[%c32, %c0_14], %4 {strides = array<i32>} : memref<216x512xf32, #tpu.memory_space<vmem>>, vector<8x512xf32>,
    %c511_i32 = arith.constant 511 : i32
    %26 = tpu.dynamic_rotate %4 by %c511_i32 dim 1 : vector<8x512xf32>, i32 -> vector<8x512xf32>
    %c12 = arith.constant 12 : index
    %c0_15 = arith.constant 0 : index
    %27 = vector.load %arg2[%c12, %c0_15] : memref<24x512xf32, #tpu.memory_space<vmem>>, vector<1x512xf32>
    %28 = vector.broadcast %27 : vector<1x512xf32> to vector<8x512xf32>
    %29 = arith.mulf %26, %28 : vector<8x512xf32>
    %c40 = arith.constant 40 : index
    %c0_16 = arith.constant 0 : index
    %30 = vector.load %arg8[%c40, %c0_16] : memref<216x512xf32, #tpu.memory_space<vmem>>, vector<8x512xf32>
    tpu.vector_store %arg8[%c40, %c0_16], %29 {strides = array<i32>} : memref<216x512xf32, #tpu.memory_space<vmem>>, vector<8x512xf32>,
    %c497_i32 = arith.constant 497 : i32
    %31 = tpu.dynamic_rotate %4 by %c497_i32 dim 1 : vector<8x512xf32>, i32 -> vector<8x512xf32>
    %c15 = arith.constant 15 : index
    %c0_17 = arith.constant 0 : index
    %32 = vector.load %arg2[%c15, %c0_17] : memref<24x512xf32, #tpu.memory_space<vmem>>, vector<1x512xf32>
    %33 = vector.broadcast %32 : vector<1x512xf32> to vector<8x512xf32>
    %34 = arith.mulf %31, %33 : vector<8x512xf32>
    %c48 = arith.constant 48 : index
    %c0_18 = arith.constant 0 : index
    %35 = vector.load %arg8[%c48, %c0_18] : memref<216x512xf32, #tpu.memory_space<vmem>>, vector<8x512xf32>
    tpu.vector_store %arg8[%c48, %c0_18], %34 {strides = array<i32>} : memref<216x512xf32, #tpu.memory_space<vmem>>, vector<8x512xf32>,
    %c496_i32 = arith.constant 496 : i32
    %36 = tpu.dynamic_rotate %4 by %c496_i32 dim 1 : vector<8x512xf32>, i32 -> vector<8x512xf32>
    %c16_19 = arith.constant 16 : index
    %c0_20 = arith.constant 0 : index
    %37 = vector.load %arg2[%c16_19, %c0_20] : memref<24x512xf32, #tpu.memory_space<vmem>>, vector<1x512xf32>
    %38 = vector.broadcast %37 : vector<1x512xf32> to vector<8x512xf32>
    %39 = arith.mulf %36, %38 : vector<8x512xf32>
    %c56 = arith.constant 56 : index
    %c0_21 = arith.constant 0 : index
    %40 = vector.load %arg8[%c56, %c0_21] : memref<216x512xf32, #tpu.memory_space<vmem>>, vector<8x512xf32>
    tpu.vector_store %arg8[%c56, %c0_21], %39 {strides = array<i32>} : memref<216x512xf32, #tpu.memory_space<vmem>>, vector<8x512xf32>,
    %c495_i32 = arith.constant 495 : i32
    %41 = tpu.dynamic_rotate %4 by %c495_i32 dim 1 : vector<8x512xf32>, i32 -> vector<8x512xf32>
    %c17 = arith.constant 17 : index
    %c0_22 = arith.constant 0 : index
    %42 = vector.load %arg2[%c17, %c0_22] : memref<24x512xf32, #tpu.memory_space<vmem>>, vector<1x512xf32>
    %43 = vector.broadcast %42 : vector<1x512xf32> to vector<8x512xf32>
    %44 = arith.mulf %41, %43 : vector<8x512xf32>
    %c64 = arith.constant 64 : index
    %c0_23 = arith.constant 0 : index
    %45 = vector.load %arg8[%c64, %c0_23] : memref<216x512xf32, #tpu.memory_space<vmem>>, vector<8x512xf32>
    tpu.vector_store %arg8[%c64, %c0_23], %44 {strides = array<i32>} : memref<216x512xf32, #tpu.memory_space<vmem>>, vector<8x512xf32>,
    %c34_i32 = arith.constant 34 : i32
    %46 = tpu.dynamic_rotate %4 by %c34_i32 dim 1 : vector<8x512xf32>, i32 -> vector<8x512xf32>
    %c3 = arith.constant 3 : index
    %c0_24 = arith.constant 0 : index
    %47 = vector.load %arg2[%c3, %c0_24] : memref<24x512xf32, #tpu.memory_space<vmem>>, vector<1x512xf32>
    %48 = vector.broadcast %47 : vector<1x512xf32> to vector<8x512xf32>
    %49 = arith.mulf %46, %48 : vector<8x512xf32>
    %c72 = arith.constant 72 : index
    %c0_25 = arith.constant 0 : index
    %50 = vector.load %arg8[%c72, %c0_25] : memref<216x512xf32, #tpu.memory_space<vmem>>, vector<8x512xf32>
    tpu.vector_store %arg8[%c72, %c0_25], %49 {strides = array<i32>} : memref<216x512xf32, #tpu.memory_space<vmem>>, vector<8x512xf32>,
    %c32_i32 = arith.constant 32 : i32
    %51 = tpu.dynamic_rotate %4 by %c32_i32 dim 1 : vector<8x512xf32>, i32 -> vector<8x512xf32>
    %c4 = arith.constant 4 : index
    %c0_26 = arith.constant 0 : index
    %52 = vector.load %arg2[%c4, %c0_26] : memref<24x512xf32, #tpu.memory_space<vmem>>, vector<1x512xf32>
    %53 = vector.broadcast %52 : vector<1x512xf32> to vector<8x512xf32>
    %54 = arith.mulf %51, %53 : vector<8x512xf32>
    %c80 = arith.constant 80 : index
    %c0_27 = arith.constant 0 : index
    %55 = vector.load %arg8[%c80, %c0_27] : memref<216x512xf32, #tpu.memory_space<vmem>>, vector<8x512xf32>
    tpu.vector_store %arg8[%c80, %c0_27], %54 {strides = array<i32>} : memref<216x512xf32, #tpu.memory_space<vmem>>, vector<8x512xf32>,
    %c30_i32 = arith.constant 30 : i32
    %56 = tpu.dynamic_rotate %4 by %c30_i32 dim 1 : vector<8x512xf32>, i32 -> vector<8x512xf32>
    %c5 = arith.constant 5 : index
    %c0_28 = arith.constant 0 : index
    %57 = vector.load %arg2[%c5, %c0_28] : memref<24x512xf32, #tpu.memory_space<vmem>>, vector<1x512xf32>
    %58 = vector.broadcast %57 : vector<1x512xf32> to vector<8x512xf32>
    %59 = arith.mulf %56, %58 : vector<8x512xf32>
    %c88 = arith.constant 88 : index
    %c0_29 = arith.constant 0 : index
    %60 = vector.load %arg8[%c88, %c0_29] : memref<216x512xf32, #tpu.memory_space<vmem>>, vector<8x512xf32>
    tpu.vector_store %arg8[%c88, %c0_29], %59 {strides = array<i32>} : memref<216x512xf32, #tpu.memory_space<vmem>>, vector<8x512xf32>,
    %c2_i32 = arith.constant 2 : i32
    %61 = tpu.dynamic_rotate %4 by %c2_i32 dim 1 : vector<8x512xf32>, i32 -> vector<8x512xf32>
    %c10 = arith.constant 10 : index
    %c0_30 = arith.constant 0 : index
    %62 = vector.load %arg2[%c10, %c0_30] : memref<24x512xf32, #tpu.memory_space<vmem>>, vector<1x512xf32>
    %63 = vector.broadcast %62 : vector<1x512xf32> to vector<8x512xf32>
    %64 = arith.mulf %61, %63 : vector<8x512xf32>
    %c96 = arith.constant 96 : index
    %c0_31 = arith.constant 0 : index
    %65 = vector.load %arg8[%c96, %c0_31] : memref<216x512xf32, #tpu.memory_space<vmem>>, vector<8x512xf32>
    tpu.vector_store %arg8[%c96, %c0_31], %64 {strides = array<i32>} : memref<216x512xf32, #tpu.memory_space<vmem>>, vector<8x512xf32>,
    %c104 = arith.constant 104 : index
    %c0_32 = arith.constant 0 : index
    %66 = vector.load %arg8[%c104, %c0_32] : memref<216x512xf32, #tpu.memory_space<vmem>>, vector<8x512xf32>
    tpu.vector_store %arg8[%c104, %c0_32], %4 {strides = array<i32>} : memref<216x512xf32, #tpu.memory_space<vmem>>, vector<8x512xf32>,
    %c510_i32 = arith.constant 510 : i32
    %67 = tpu.dynamic_rotate %4 by %c510_i32 dim 1 : vector<8x512xf32>, i32 -> vector<8x512xf32>
    %c13 = arith.constant 13 : index
    %c0_33 = arith.constant 0 : index
    %68 = vector.load %arg2[%c13, %c0_33] : memref<24x512xf32, #tpu.memory_space<vmem>>, vector<1x512xf32>
    %69 = vector.broadcast %68 : vector<1x512xf32> to vector<8x512xf32>
    %70 = arith.mulf %67, %69 : vector<8x512xf32>
    %c112 = arith.constant 112 : index
    %c0_34 = arith.constant 0 : index
    %71 = vector.load %arg8[%c112, %c0_34] : memref<216x512xf32, #tpu.memory_space<vmem>>, vector<8x512xf32>
    tpu.vector_store %arg8[%c112, %c0_34], %70 {strides = array<i32>} : memref<216x512xf32, #tpu.memory_space<vmem>>, vector<8x512xf32>,
    %c482_i32 = arith.constant 482 : i32
    %72 = tpu.dynamic_rotate %4 by %c482_i32 dim 1 : vector<8x512xf32>, i32 -> vector<8x512xf32>
    %c18 = arith.constant 18 : index
    %c0_35 = arith.constant 0 : index
    %73 = vector.load %arg2[%c18, %c0_35] : memref<24x512xf32, #tpu.memory_space<vmem>>, vector<1x512xf32>
    %74 = vector.broadcast %73 : vector<1x512xf32> to vector<8x512xf32>
    %75 = arith.mulf %72, %74 : vector<8x512xf32>
    %c120 = arith.constant 120 : index
    %c0_36 = arith.constant 0 : index
    %76 = vector.load %arg8[%c120, %c0_36] : memref<216x512xf32, #tpu.memory_space<vmem>>, vector<8x512xf32>
    tpu.vector_store %arg8[%c120, %c0_36], %75 {strides = array<i32>} : memref<216x512xf32, #tpu.memory_space<vmem>>, vector<8x512xf32>,
    %c480_i32 = arith.constant 480 : i32
    %77 = tpu.dynamic_rotate %4 by %c480_i32 dim 1 : vector<8x512xf32>, i32 -> vector<8x512xf32>
    %c19 = arith.constant 19 : index
    %c0_37 = arith.constant 0 : index
    %78 = vector.load %arg2[%c19, %c0_37] : memref<24x512xf32, #tpu.memory_space<vmem>>, vector<1x512xf32>
    %79 = vector.broadcast %78 : vector<1x512xf32> to vector<8x512xf32>
    %80 = arith.mulf %77, %79 : vector<8x512xf32>
    %c128 = arith.constant 128 : index
    %c0_38 = arith.constant 0 : index
    %81 = vector.load %arg8[%c128, %c0_38] : memref<216x512xf32, #tpu.memory_space<vmem>>, vector<8x512xf32>
    tpu.vector_store %arg8[%c128, %c0_38], %80 {strides = array<i32>} : memref<216x512xf32, #tpu.memory_space<vmem>>, vector<8x512xf32>,
    %c478_i32 = arith.constant 478 : i32
    %82 = tpu.dynamic_rotate %4 by %c478_i32 dim 1 : vector<8x512xf32>, i32 -> vector<8x512xf32>
    %c20 = arith.constant 20 : index
    %c0_39 = arith.constant 0 : index
    %83 = vector.load %arg2[%c20, %c0_39] : memref<24x512xf32, #tpu.memory_space<vmem>>, vector<1x512xf32>
    %84 = vector.broadcast %83 : vector<1x512xf32> to vector<8x512xf32>
    %85 = arith.mulf %82, %84 : vector<8x512xf32>
    %c136 = arith.constant 136 : index
    %c0_40 = arith.constant 0 : index
    %86 = vector.load %arg8[%c136, %c0_40] : memref<216x512xf32, #tpu.memory_space<vmem>>, vector<8x512xf32>
    tpu.vector_store %arg8[%c136, %c0_40], %85 {strides = array<i32>} : memref<216x512xf32, #tpu.memory_space<vmem>>, vector<8x512xf32>,
    %c51_i32 = arith.constant 51 : i32
    %87 = tpu.dynamic_rotate %4 by %c51_i32 dim 1 : vector<8x512xf32>, i32 -> vector<8x512xf32>
    %c0_41 = arith.constant 0 : index
    %c0_42 = arith.constant 0 : index
    %88 = vector.load %arg2[%c0_41, %c0_42] : memref<24x512xf32, #tpu.memory_space<vmem>>, vector<1x512xf32>
    %89 = vector.broadcast %88 : vector<1x512xf32> to vector<8x512xf32>
    %90 = arith.mulf %87, %89 : vector<8x512xf32>
    %c144 = arith.constant 144 : index
    %c0_43 = arith.constant 0 : index
    %91 = vector.load %arg8[%c144, %c0_43] : memref<216x512xf32, #tpu.memory_space<vmem>>, vector<8x512xf32>
    tpu.vector_store %arg8[%c144, %c0_43], %90 {strides = array<i32>} : memref<216x512xf32, #tpu.memory_space<vmem>>, vector<8x512xf32>,
    %c48_i32 = arith.constant 48 : i32
    %92 = tpu.dynamic_rotate %4 by %c48_i32 dim 1 : vector<8x512xf32>, i32 -> vector<8x512xf32>
    %c1_44 = arith.constant 1 : index
    %c0_45 = arith.constant 0 : index
    %93 = vector.load %arg2[%c1_44, %c0_45] : memref<24x512xf32, #tpu.memory_space<vmem>>, vector<1x512xf32>
    %94 = vector.broadcast %93 : vector<1x512xf32> to vector<8x512xf32>
    %95 = arith.mulf %92, %94 : vector<8x512xf32>
    %c152 = arith.constant 152 : index
    %c0_46 = arith.constant 0 : index
    %96 = vector.load %arg8[%c152, %c0_46] : memref<216x512xf32, #tpu.memory_space<vmem>>, vector<8x512xf32>
    tpu.vector_store %arg8[%c152, %c0_46], %95 {strides = array<i32>} : memref<216x512xf32, #tpu.memory_space<vmem>>, vector<8x512xf32>,
    %c45_i32 = arith.constant 45 : i32
    %97 = tpu.dynamic_rotate %4 by %c45_i32 dim 1 : vector<8x512xf32>, i32 -> vector<8x512xf32>
    %c2 = arith.constant 2 : index
    %c0_47 = arith.constant 0 : index
    %98 = vector.load %arg2[%c2, %c0_47] : memref<24x512xf32, #tpu.memory_space<vmem>>, vector<1x512xf32>
    %99 = vector.broadcast %98 : vector<1x512xf32> to vector<8x512xf32>
    %100 = arith.mulf %97, %99 : vector<8x512xf32>
    %c160 = arith.constant 160 : index
    %c0_48 = arith.constant 0 : index
    %101 = vector.load %arg8[%c160, %c0_48] : memref<216x512xf32, #tpu.memory_space<vmem>>, vector<8x512xf32>
    tpu.vector_store %arg8[%c160, %c0_48], %100 {strides = array<i32>} : memref<216x512xf32, #tpu.memory_space<vmem>>, vector<8x512xf32>,
    %c3_i32 = arith.constant 3 : i32
    %102 = tpu.dynamic_rotate %4 by %c3_i32 dim 1 : vector<8x512xf32>, i32 -> vector<8x512xf32>
    %c9 = arith.constant 9 : index
    %c0_49 = arith.constant 0 : index
    %103 = vector.load %arg2[%c9, %c0_49] : memref<24x512xf32, #tpu.memory_space<vmem>>, vector<1x512xf32>
    %104 = vector.broadcast %103 : vector<1x512xf32> to vector<8x512xf32>
    %105 = arith.mulf %102, %104 : vector<8x512xf32>
    %c168 = arith.constant 168 : index
    %c0_50 = arith.constant 0 : index
    %106 = vector.load %arg8[%c168, %c0_50] : memref<216x512xf32, #tpu.memory_space<vmem>>, vector<8x512xf32>
    tpu.vector_store %arg8[%c168, %c0_50], %105 {strides = array<i32>} : memref<216x512xf32, #tpu.memory_space<vmem>>, vector<8x512xf32>,
    %c176 = arith.constant 176 : index
    %c0_51 = arith.constant 0 : index
    %107 = vector.load %arg8[%c176, %c0_51] : memref<216x512xf32, #tpu.memory_space<vmem>>, vector<8x512xf32>
    tpu.vector_store %arg8[%c176, %c0_51], %4 {strides = array<i32>} : memref<216x512xf32, #tpu.memory_space<vmem>>, vector<8x512xf32>,
    %c509_i32 = arith.constant 509 : i32
    %108 = tpu.dynamic_rotate %4 by %c509_i32 dim 1 : vector<8x512xf32>, i32 -> vector<8x512xf32>
    %c14 = arith.constant 14 : index
    %c0_52 = arith.constant 0 : index
    %109 = vector.load %arg2[%c14, %c0_52] : memref<24x512xf32, #tpu.memory_space<vmem>>, vector<1x512xf32>
    %110 = vector.broadcast %109 : vector<1x512xf32> to vector<8x512xf32>
    %111 = arith.mulf %108, %110 : vector<8x512xf32>
    %c184 = arith.constant 184 : index
    %c0_53 = arith.constant 0 : index
    %112 = vector.load %arg8[%c184, %c0_53] : memref<216x512xf32, #tpu.memory_space<vmem>>, vector<8x512xf32>
    tpu.vector_store %arg8[%c184, %c0_53], %111 {strides = array<i32>} : memref<216x512xf32, #tpu.memory_space<vmem>>, vector<8x512xf32>,
    %c467_i32 = arith.constant 467 : i32
    %113 = tpu.dynamic_rotate %4 by %c467_i32 dim 1 : vector<8x512xf32>, i32 -> vector<8x512xf32>
    %c21 = arith.constant 21 : index
    %c0_54 = arith.constant 0 : index
    %114 = vector.load %arg2[%c21, %c0_54] : memref<24x512xf32, #tpu.memory_space<vmem>>, vector<1x512xf32>
    %115 = vector.broadcast %114 : vector<1x512xf32> to vector<8x512xf32>
    %116 = arith.mulf %113, %115 : vector<8x512xf32>
    %c192 = arith.constant 192 : index
    %c0_55 = arith.constant 0 : index
    %117 = vector.load %arg8[%c192, %c0_55] : memref<216x512xf32, #tpu.memory_space<vmem>>, vector<8x512xf32>
    tpu.vector_store %arg8[%c192, %c0_55], %116 {strides = array<i32>} : memref<216x512xf32, #tpu.memory_space<vmem>>, vector<8x512xf32>,
    %c464_i32 = arith.constant 464 : i32
    %118 = tpu.dynamic_rotate %4 by %c464_i32 dim 1 : vector<8x512xf32>, i32 -> vector<8x512xf32>
    %c22 = arith.constant 22 : index
    %c0_56 = arith.constant 0 : index
    %119 = vector.load %arg2[%c22, %c0_56] : memref<24x512xf32, #tpu.memory_space<vmem>>, vector<1x512xf32>
    %120 = vector.broadcast %119 : vector<1x512xf32> to vector<8x512xf32>
    %121 = arith.mulf %118, %120 : vector<8x512xf32>
    %c200 = arith.constant 200 : index
    %c0_57 = arith.constant 0 : index
    %122 = vector.load %arg8[%c200, %c0_57] : memref<216x512xf32, #tpu.memory_space<vmem>>, vector<8x512xf32>
    tpu.vector_store %arg8[%c200, %c0_57], %121 {strides = array<i32>} : memref<216x512xf32, #tpu.memory_space<vmem>>, vector<8x512xf32>,
    %c461_i32 = arith.constant 461 : i32
    %123 = tpu.dynamic_rotate %4 by %c461_i32 dim 1 : vector<8x512xf32>, i32 -> vector<8x512xf32>
    %c23 = arith.constant 23 : index
    %c0_58 = arith.constant 0 : index
    %124 = vector.load %arg2[%c23, %c0_58] : memref<24x512xf32, #tpu.memory_space<vmem>>, vector<1x512xf32>
    %125 = vector.broadcast %124 : vector<1x512xf32> to vector<8x512xf32>
    %126 = arith.mulf %123, %125 : vector<8x512xf32>
    %c208 = arith.constant 208 : index
    %c0_59 = arith.constant 0 : index
    %127 = vector.load %arg8[%c208, %c0_59] : memref<216x512xf32, #tpu.memory_space<vmem>>, vector<8x512xf32>
    tpu.vector_store %arg8[%c208, %c0_59], %126 {strides = array<i32>} : memref<216x512xf32, #tpu.memory_space<vmem>>, vector<8x512xf32>,
    %c0_60 = arith.constant 0 : index
    %c0_61 = arith.constant 0 : index
    %128 = vector.load %arg3[%c0_60, %c0_61] : memref<24x216xf32, #tpu.memory_space<vmem>>, vector<24x216xf32>
    %c0_62 = arith.constant 0 : index
    %c0_63 = arith.constant 0 : index
    %129 = vector.load %arg8[%c0_62, %c0_63] : memref<216x512xf32, #tpu.memory_space<vmem>>, vector<216x512xf32>
    %cst = arith.constant dense<0.000000e+00> : vector<24x512xf32>
    %130 = tpu.matmul %128, %129, %cst {dimension_numbers = #tpu.dot_dimension_numbers<[1], [0], [0], [1], [0, 0, 1, 1], [], []>} : vector<24x216xf32>, vector<216x512xf32>, vector<24x512xf32> -> vector<24x512xf32>
    %c0_64 = arith.constant 0 : index
    %c0_65 = arith.constant 0 : index
    %131 = vector.load %arg4[%c0_64, %c0_65] : memref<24x1xf32, #tpu.memory_space<vmem>>, vector<24x1xf32>
    %132 = vector.broadcast %131 : vector<24x1xf32> to vector<24x512xf32>
    %133 = arith.addf %130, %132 : vector<24x512xf32>
    %cst_66 = arith.constant 0.000000e+00 : f32
    %134 = vector.broadcast %cst_66 : f32 to vector<24x512xf32>
    %135 = arith.maximumf %133, %134 : vector<24x512xf32>
    %cst_67 = arith.constant 0.000000e+00 : f32
    %136 = vector.broadcast %cst_67 : f32 to vector<1x512xf32>
    %c0_68 = arith.constant 0 : index
    %c0_69 = arith.constant 0 : index
    %137 = vector.load %arg6[%c0_68, %c0_69] : memref<1x1xf32, #tpu.memory_space<vmem>>, vector<1x1xf32>
    %138 = vector.broadcast %137 : vector<1x1xf32> to vector<1x512xf32>
    %139 = arith.addf %136, %138 : vector<1x512xf32>
    %c0_70 = arith.constant 0 : index
    %c0_71 = arith.constant 0 : index
    %140 = vector.load %arg5[%c0_70, %c0_71] : memref<9x24xf32, #tpu.memory_space<vmem>>, vector<1x24xf32>
    %c17_i32_72 = arith.constant 17 : i32
    %141 = tpu.dynamic_rotate %135 by %c17_i32_72 dim 1 : vector<24x512xf32>, i32 -> vector<24x512xf32>
    %c6_73 = arith.constant 6 : index
    %c0_74 = arith.constant 0 : index
    %142 = vector.load %arg2[%c6_73, %c0_74] : memref<24x512xf32, #tpu.memory_space<vmem>>, vector<1x512xf32>
    %143 = vector.broadcast %142 : vector<1x512xf32> to vector<24x512xf32>
    %144 = arith.mulf %141, %143 : vector<24x512xf32>
    %cst_75 = arith.constant dense<0.000000e+00> : vector<1x512xf32>
    %145 = tpu.matmul %140, %144, %cst_75 {dimension_numbers = #tpu.dot_dimension_numbers<[1], [0], [0], [1], [0, 0, 1, 1], [], []>} : vector<1x24xf32>, vector<24x512xf32>, vector<1x512xf32> -> vector<1x512xf32>
    %146 = arith.addf %139, %145 : vector<1x512xf32>
    %c1_76 = arith.constant 1 : index
    %c0_77 = arith.constant 0 : index
    %147 = vector.load %arg5[%c1_76, %c0_77] : memref<9x24xf32, #tpu.memory_space<vmem>>, vector<1x24xf32>
    %c16_i32_78 = arith.constant 16 : i32
    %148 = tpu.dynamic_rotate %135 by %c16_i32_78 dim 1 : vector<24x512xf32>, i32 -> vector<24x512xf32>
    %c7_79 = arith.constant 7 : index
    %c0_80 = arith.constant 0 : index
    %149 = vector.load %arg2[%c7_79, %c0_80] : memref<24x512xf32, #tpu.memory_space<vmem>>, vector<1x512xf32>
    %150 = vector.broadcast %149 : vector<1x512xf32> to vector<24x512xf32>
    %151 = arith.mulf %148, %150 : vector<24x512xf32>
    %cst_81 = arith.constant dense<0.000000e+00> : vector<1x512xf32>
    %152 = tpu.matmul %147, %151, %cst_81 {dimension_numbers = #tpu.dot_dimension_numbers<[1], [0], [0], [1], [0, 0, 1, 1], [], []>} : vector<1x24xf32>, vector<24x512xf32>, vector<1x512xf32> -> vector<1x512xf32>
    %153 = arith.addf %146, %152 : vector<1x512xf32>
    %c2_82 = arith.constant 2 : index
    %c0_83 = arith.constant 0 : index
    %154 = vector.load %arg5[%c2_82, %c0_83] : memref<9x24xf32, #tpu.memory_space<vmem>>, vector<1x24xf32>
    %c15_i32_84 = arith.constant 15 : i32
    %155 = tpu.dynamic_rotate %135 by %c15_i32_84 dim 1 : vector<24x512xf32>, i32 -> vector<24x512xf32>
    %c8_85 = arith.constant 8 : index
    %c0_86 = arith.constant 0 : index
    %156 = vector.load %arg2[%c8_85, %c0_86] : memref<24x512xf32, #tpu.memory_space<vmem>>, vector<1x512xf32>
    %157 = vector.broadcast %156 : vector<1x512xf32> to vector<24x512xf32>
    %158 = arith.mulf %155, %157 : vector<24x512xf32>
    %cst_87 = arith.constant dense<0.000000e+00> : vector<1x512xf32>
    %159 = tpu.matmul %154, %158, %cst_87 {dimension_numbers = #tpu.dot_dimension_numbers<[1], [0], [0], [1], [0, 0, 1, 1], [], []>} : vector<1x24xf32>, vector<24x512xf32>, vector<1x512xf32> -> vector<1x512xf32>
    %160 = arith.addf %153, %159 : vector<1x512xf32>
    %c3_88 = arith.constant 3 : index
    %c0_89 = arith.constant 0 : index
    %161 = vector.load %arg5[%c3_88, %c0_89] : memref<9x24xf32, #tpu.memory_space<vmem>>, vector<1x24xf32>
    %c1_i32_90 = arith.constant 1 : i32
    %162 = tpu.dynamic_rotate %135 by %c1_i32_90 dim 1 : vector<24x512xf32>, i32 -> vector<24x512xf32>
    %c11_91 = arith.constant 11 : index
    %c0_92 = arith.constant 0 : index
    %163 = vector.load %arg2[%c11_91, %c0_92] : memref<24x512xf32, #tpu.memory_space<vmem>>, vector<1x512xf32>
    %164 = vector.broadcast %163 : vector<1x512xf32> to vector<24x512xf32>
    %165 = arith.mulf %162, %164 : vector<24x512xf32>
    %cst_93 = arith.constant dense<0.000000e+00> : vector<1x512xf32>
    %166 = tpu.matmul %161, %165, %cst_93 {dimension_numbers = #tpu.dot_dimension_numbers<[1], [0], [0], [1], [0, 0, 1, 1], [], []>} : vector<1x24xf32>, vector<24x512xf32>, vector<1x512xf32> -> vector<1x512xf32>
    %167 = arith.addf %160, %166 : vector<1x512xf32>
    %c4_94 = arith.constant 4 : index
    %c0_95 = arith.constant 0 : index
    %168 = vector.load %arg5[%c4_94, %c0_95] : memref<9x24xf32, #tpu.memory_space<vmem>>, vector<1x24xf32>
    %cst_96 = arith.constant dense<0.000000e+00> : vector<1x512xf32>
    %169 = tpu.matmul %168, %135, %cst_96 {dimension_numbers = #tpu.dot_dimension_numbers<[1], [0], [0], [1], [0, 0, 1, 1], [], []>} : vector<1x24xf32>, vector<24x512xf32>, vector<1x512xf32> -> vector<1x512xf32>
    %170 = arith.addf %167, %169 : vector<1x512xf32>
    %c5_97 = arith.constant 5 : index
    %c0_98 = arith.constant 0 : index
    %171 = vector.load %arg5[%c5_97, %c0_98] : memref<9x24xf32, #tpu.memory_space<vmem>>, vector<1x24xf32>
    %c511_i32_99 = arith.constant 511 : i32
    %172 = tpu.dynamic_rotate %135 by %c511_i32_99 dim 1 : vector<24x512xf32>, i32 -> vector<24x512xf32>
    %c12_100 = arith.constant 12 : index
    %c0_101 = arith.constant 0 : index
    %173 = vector.load %arg2[%c12_100, %c0_101] : memref<24x512xf32, #tpu.memory_space<vmem>>, vector<1x512xf32>
    %174 = vector.broadcast %173 : vector<1x512xf32> to vector<24x512xf32>
    %175 = arith.mulf %172, %174 : vector<24x512xf32>
    %cst_102 = arith.constant dense<0.000000e+00> : vector<1x512xf32>
    %176 = tpu.matmul %171, %175, %cst_102 {dimension_numbers = #tpu.dot_dimension_numbers<[1], [0], [0], [1], [0, 0, 1, 1], [], []>} : vector<1x24xf32>, vector<24x512xf32>, vector<1x512xf32> -> vector<1x512xf32>
    %177 = arith.addf %170, %176 : vector<1x512xf32>
    %c6_103 = arith.constant 6 : index
    %c0_104 = arith.constant 0 : index
    %178 = vector.load %arg5[%c6_103, %c0_104] : memref<9x24xf32, #tpu.memory_space<vmem>>, vector<1x24xf32>
    %c497_i32_105 = arith.constant 497 : i32
    %179 = tpu.dynamic_rotate %135 by %c497_i32_105 dim 1 : vector<24x512xf32>, i32 -> vector<24x512xf32>
    %c15_106 = arith.constant 15 : index
    %c0_107 = arith.constant 0 : index
    %180 = vector.load %arg2[%c15_106, %c0_107] : memref<24x512xf32, #tpu.memory_space<vmem>>, vector<1x512xf32>
    %181 = vector.broadcast %180 : vector<1x512xf32> to vector<24x512xf32>
    %182 = arith.mulf %179, %181 : vector<24x512xf32>
    %cst_108 = arith.constant dense<0.000000e+00> : vector<1x512xf32>
    %183 = tpu.matmul %178, %182, %cst_108 {dimension_numbers = #tpu.dot_dimension_numbers<[1], [0], [0], [1], [0, 0, 1, 1], [], []>} : vector<1x24xf32>, vector<24x512xf32>, vector<1x512xf32> -> vector<1x512xf32>
    %184 = arith.addf %177, %183 : vector<1x512xf32>
    %c7_109 = arith.constant 7 : index
    %c0_110 = arith.constant 0 : index
    %185 = vector.load %arg5[%c7_109, %c0_110] : memref<9x24xf32, #tpu.memory_space<vmem>>, vector<1x24xf32>
    %c496_i32_111 = arith.constant 496 : i32
    %186 = tpu.dynamic_rotate %135 by %c496_i32_111 dim 1 : vector<24x512xf32>, i32 -> vector<24x512xf32>
    %c16_112 = arith.constant 16 : index
    %c0_113 = arith.constant 0 : index
    %187 = vector.load %arg2[%c16_112, %c0_113] : memref<24x512xf32, #tpu.memory_space<vmem>>, vector<1x512xf32>
    %188 = vector.broadcast %187 : vector<1x512xf32> to vector<24x512xf32>
    %189 = arith.mulf %186, %188 : vector<24x512xf32>
    %cst_114 = arith.constant dense<0.000000e+00> : vector<1x512xf32>
    %190 = tpu.matmul %185, %189, %cst_114 {dimension_numbers = #tpu.dot_dimension_numbers<[1], [0], [0], [1], [0, 0, 1, 1], [], []>} : vector<1x24xf32>, vector<24x512xf32>, vector<1x512xf32> -> vector<1x512xf32>
    %191 = arith.addf %184, %190 : vector<1x512xf32>
    %c8_115 = arith.constant 8 : index
    %c0_116 = arith.constant 0 : index
    %192 = vector.load %arg5[%c8_115, %c0_116] : memref<9x24xf32, #tpu.memory_space<vmem>>, vector<1x24xf32>
    %c495_i32_117 = arith.constant 495 : i32
    %193 = tpu.dynamic_rotate %135 by %c495_i32_117 dim 1 : vector<24x512xf32>, i32 -> vector<24x512xf32>
    %c17_118 = arith.constant 17 : index
    %c0_119 = arith.constant 0 : index
    %194 = vector.load %arg2[%c17_118, %c0_119] : memref<24x512xf32, #tpu.memory_space<vmem>>, vector<1x512xf32>
    %195 = vector.broadcast %194 : vector<1x512xf32> to vector<24x512xf32>
    %196 = arith.mulf %193, %195 : vector<24x512xf32>
    %cst_120 = arith.constant dense<0.000000e+00> : vector<1x512xf32>
    %197 = tpu.matmul %192, %196, %cst_120 {dimension_numbers = #tpu.dot_dimension_numbers<[1], [0], [0], [1], [0, 0, 1, 1], [], []>} : vector<1x24xf32>, vector<24x512xf32>, vector<1x512xf32> -> vector<1x512xf32>
    %198 = arith.addf %191, %197 : vector<1x512xf32>
    %199 = math.tanh %198 : vector<1x512xf32>
    %200 = vector.extract_strided_slice %199 {offsets = [0, 0], sizes = [1, 256], strides = [1, 1]} : vector<1x512xf32> to vector<1x256xf32>
    %c0_121 = arith.constant 0 : index
    %c0_122 = arith.constant 0 : index
    %c0_123 = arith.constant 0 : index
    %201 = vector.load %arg7[%c0_121, %c0_122, %c0_123] : memref<2x1x256xf32, #tpu.memory_space<vmem>>, vector<1x1x256xf32>
    %202 = vector.shape_cast %201 : vector<1x1x256xf32> to vector<1x256xf32>
    %203 = vector.shape_cast %200 : vector<1x256xf32> to vector<1x1x256xf32>
    tpu.vector_store %arg7[%c0_121, %c0_122, %c0_123], %203 {strides = array<i32>} : memref<2x1x256xf32, #tpu.memory_space<vmem>>, vector<1x1x256xf32>,
    %204 = vector.extract_strided_slice %199 {offsets = [0, 256], sizes = [1, 256], strides = [1, 1]} : vector<1x512xf32> to vector<1x256xf32>
    %c1_124 = arith.constant 1 : index
    %c0_125 = arith.constant 0 : index
    %c0_126 = arith.constant 0 : index
    %205 = vector.load %arg7[%c1_124, %c0_125, %c0_126] : memref<2x1x256xf32, #tpu.memory_space<vmem>>, vector<1x1x256xf32>
    %206 = vector.shape_cast %205 : vector<1x1x256xf32> to vector<1x256xf32>
    %207 = vector.shape_cast %204 : vector<1x256xf32> to vector<1x1x256xf32>
    tpu.vector_store %arg7[%c1_124, %c0_125, %c0_126], %207 {strides = array<i32>} : memref<2x1x256xf32, #tpu.memory_space<vmem>>, vector<1x1x256xf32>,
    return
  }
  func.func @transform_0(%arg0: i32) -> (i32, i32, i32) {
    %c0_i32 = arith.constant 0 : i32
    %c0_i32_0 = arith.constant 0 : i32
    %c0_i32_1 = arith.constant 0 : i32
    return %arg0, %c0_i32, %c0_i32_0 : i32, i32, i32
  }
  func.func @transform_1(%arg0: i32) -> (i32, i32) {
    %c0_i32 = arith.constant 0 : i32
    %c0_i32_0 = arith.constant 0 : i32
    %c0_i32_1 = arith.constant 0 : i32
    return %c0_i32, %c0_i32_0 : i32, i32
  }
  func.func @transform_2(%arg0: i32) -> (i32, i32) {
    %c0_i32 = arith.constant 0 : i32
    %c0_i32_0 = arith.constant 0 : i32
    %c0_i32_1 = arith.constant 0 : i32
    return %c0_i32, %c0_i32_0 : i32, i32
  }
  func.func @transform_3(%arg0: i32) -> (i32, i32) {
    %c0_i32 = arith.constant 0 : i32
    %c0_i32_0 = arith.constant 0 : i32
    %c0_i32_1 = arith.constant 0 : i32
    return %c0_i32, %c0_i32_0 : i32, i32
  }
  func.func @transform_4(%arg0: i32) -> (i32, i32) {
    %c0_i32 = arith.constant 0 : i32
    %c0_i32_0 = arith.constant 0 : i32
    %c0_i32_1 = arith.constant 0 : i32
    return %c0_i32, %c0_i32_0 : i32, i32
  }
  func.func @transform_5(%arg0: i32) -> (i32, i32) {
    %c0_i32 = arith.constant 0 : i32
    %c0_i32_0 = arith.constant 0 : i32
    %c0_i32_1 = arith.constant 0 : i32
    return %c0_i32, %c0_i32_0 : i32, i32
  }
  func.func @transform_6(%arg0: i32) -> (i32, i32, i32) {
    %c0_i32 = arith.constant 0 : i32
    %c0_i32_0 = arith.constant 0 : i32
    %c0_i32_1 = arith.constant 0 : i32
    return %arg0, %c0_i32, %c0_i32_0 : i32, i32, i32
  }
}

</mosaic_0001>

<bundles_post_ra>
// kernel: forward.1
= control target key start
LH: loop header
LB: loop body
LE: loop exit
PB: predicated region body
PF: predicated region fallthrough
CT: control target
= control target key end

     0   :  { %s3491_s25 = smov 98   ;;  %s3492_s30 = smov 126   ;;  %v4858_v4 = vlaneseq  ;;  %vm1231_vm9 = vcmask 719872   ;;  %s4851_s0 = inlined_call_operand.vmem [shape: f32[2,8,256], index: 0, kind: input, shape index: {}]   ;;  %s4852_s1 = inlined_call_operand.vmem [shape: f32[24,512], index: 1, kind: input, shape index: {}]   ;;  %s4853_s2 = inlined_call_operand.vmem [shape: f32[24,216], index: 2, kind: input, shape index: {}]   ;;  %s4854_s3 = inlined_call_operand.vmem [shape: f32[24,1], index: 3, kind: input, shape index: {}]   ;;  %s4855_s5 = inlined_call_operand.<no memory space> [shape: f32[1,1], index: 5, kind: input, shape index: {}]   ;;  %s4856_s4 = inlined_call_operand.vmem [shape: f32[9,24], index: 4, kind: input, shape index: {}]   ;;  %s4857_s6 = inlined_call_operand.vmem [shape: f32[2,1,256], index: 6, kind: output, shape index: {}]  }
   0x1   :  { %v3556_v0 = vld [vmem:[%s4851_s0 + $0x10] sm:$0xff]  ;;  %v3561_v1 = vld [vmem:[%s4851_s0] sm:$0xff]  ;;  %v3568_v2 = vld [vmem:[%s4851_s0 + $0x18] sm:$0xff]  ;;  %s3493_s7 = smov 2   ;;  %s3494_s8 = smov 30  }
   0x2   :  { %616 = vrot.lane.b32.xlu1 %v3556_v0, %s3491_s25  ;;  %612 = vrot.lane.b32.xlu0 %v3561_v1, %s3491_s25  ;;  %v3573_v3 = vld [vmem:[%s4851_s0 + $0x8] sm:$0xff]  ;;  %s3495_s9 = smov 32   ;;  %s3496_s10 = smov 34   ;;  %v3662_v5 = vshrl.u32 %v4858_v4, 7  ;;  %v3667_v6 = vand.u32 127, %v4858_v4 }
   0x3   :  { %s3497_s11 = smov 111   ;;  %s3498_s12 = smov 112   ;;  %v3407_v11 = vld [vmem:[%s4852_s1 + $0x42] ss:$8 sm:$0xf] }
   0x4   :  { %s3499_s13 = smov 113   ;;  %s3500_s14 = smov 127   ;;  %4872 = vst [vmem:[#allocation4_spill] sm:$0xff] %v3662_v5  ;;  %v3670_v7 = vsub.s32 0, %v3662_v5  ;;  %v3673_v8 = vsub.s32 1, %v3662_v5  ;;  %v3676_v9 = vsub.s32 3, %v3662_v5 }
   0x5   :  { %s3501_s15 = smov 1   ;;  %s3502_s16 = smov 15   ;;  %v3679_v10 = vsub.s32 2, %v3662_v5  ;;  %vm620_vm0 = vcmp.lt.s32.totalorder %v3667_v6, 98  ;;  %vm576_vm1 = vcmp.lt.s32.totalorder %v3667_v6, 126  ;;  %vm528_vm2 = vcmp.lt.s32.totalorder %v3667_v6, 2 }
   0x6   :  { %618 = vrot.lane.b32.xlu1 %v3568_v2, %s3491_s25  ;;  %614 = vrot.lane.b32.xlu0 %v3573_v3, %s3491_s25  ;;  %s3503_s17 = smov 16   ;;  %s3504_s18 = smov 17   ;;  %v635_v14 = vrot.slane %v3407_v11, %v3673_v8  ;;  %v643_v15 = vrot.slane %v3407_v11, %v3676_v9  ;;  %v631_v16 = vrot.slane %v3407_v11, %v3670_v7  ;;  %v3406_v30 = vld [vmem:[%s4852_s1 + $0x25] ss:$8 sm:$0xf]  ;;  %vm484_vm3 = vcmp.lt.s32.totalorder %v3667_v6, 30 }
   0x7   :  { %s3505_s19 = smov 77   ;;  %v639_v17 = vrot.slane %v3407_v11, %v3679_v10  ;;  %s3506_s22 = smov 80   ;;  %v591_v31 = vrot.slane %v3406_v30, %v3673_v8  ;;  %v599_v32 = vrot.slane %v3406_v30, %v3676_v9  ;;  %v595_v33 = vrot.slane %v3406_v30, %v3679_v10  ;;  %v3405_v34 = vld [vmem:[%s4852_s1 + $0x22] ss:$8 sm:$0xf] }
   0x8   :  { %v587_v35 = vrot.slane %v3406_v30, %v3670_v7  ;;  %v543_v42 = vrot.slane %v3405_v34, %v3673_v8  ;;  %s3507_s27 = smov 83   ;;  %v539_v50 = vrot.slane %v3405_v34, %v3670_v7  ;;  %v551_v52 = vrot.slane %v3405_v34, %v3676_v9  ;;  %v3404_v54 = vld [vmem:[%s4852_s1 + $0x5] ss:$8 sm:$0xf]  ;;  %s3510_s20 = smov 45  }
   0x9   :  { %v547_v53 = vrot.slane %v3405_v34, %v3679_v10  ;;  %v499_v60 = vrot.slane %v3404_v54, %v3673_v8  ;;  %vm440_vm4 = vcmp.lt.s32.totalorder %v3667_v6, 32  ;;  %vm396_vm5 = vcmp.lt.s32.totalorder %v3667_v6, 34  ;;  %s3511_s21 = smov 48   ;;  %s3512_s24 = smov 51  }
   0xa   :  { %570 = vrot.lane.b32.xlu1 %v3573_v3, %s3492_s30  ;;  %568 = vrot.lane.b32.xlu0 %v3561_v1, %s3492_s30  ;;  %vm352_vm6 = vcmp.lt.s32.totalorder %v3667_v6, 111  ;;  %vm308_vm7 = vcmp.lt.s32.totalorder %v3667_v6, 112  ;;  %vm264_vm8 = vcmp.lt.s32.totalorder %v3667_v6, 113  ;;  %vm220_vm10 = vcmp.lt.s32.totalorder %v3667_v6, 127 }
   0xb   :  { %vm172_vm11 = vcmp.lt.s32.totalorder %v3667_v6, 1  ;;  %vm128_vm12 = vcmp.lt.s32.totalorder %v3667_v6, 15  ;;  %vm84_vm13 = vcmp.lt.s32.totalorder %v3667_v6, 16  ;;  %vm40_vm14 = vcmp.lt.s32.totalorder %v3667_v6, 17 }
   0xc   :  { %vm1063_vm15 = vcmp.lt.s32.totalorder %v3667_v6, 77 }
   0xe   :  { %574 = vrot.lane.b32.xlu1 %v3568_v2, %s3492_s30  ;;  %572 = vrot.lane.b32.xlu0 %v3556_v0, %s3492_s30  ;;  %s3508_s30 = smov 125  }
  0x12   :  { %522 = vrot.lane.b32.xlu1 %v3573_v3, %s3493_s7  ;;  %520 = vrot.lane.b32.xlu0 %v3561_v1, %s3493_s7 }
  0x16   :  { %526 = vrot.lane.b32.xlu1 %v3568_v2, %s3493_s7  ;;  %524 = vrot.lane.b32.xlu0 %v3556_v0, %s3493_s7 }
  0x1a   :  { %478 = vrot.lane.b32.xlu1 %v3573_v3, %s3494_s8  ;;  %476 = vrot.lane.b32.xlu0 %v3561_v1, %s3494_s8 }
  0x1e   :  { %482 = vrot.lane.b32.xlu1 %v3568_v2, %s3494_s8  ;;  %480 = vrot.lane.b32.xlu0 %v3556_v0, %s3494_s8  ;;  %s3514_s8 = smov 96  }
  0x22   :  { %434 = vrot.lane.b32.xlu1 %v3573_v3, %s3495_s9  ;;  %432 = vrot.lane.b32.xlu0 %v3561_v1, %s3495_s9 }
  0x26   :  { %438 = vrot.lane.b32.xlu1 %v3568_v2, %s3495_s9  ;;  %436 = vrot.lane.b32.xlu0 %v3556_v0, %s3495_s9  ;;  %s3509_s9 = smov 3  }
  0x2a   :  { %390 = vrot.lane.b32.xlu1 %v3573_v3, %s3496_s10  ;;  %388 = vrot.lane.b32.xlu0 %v3561_v1, %s3496_s10 }
  0x2e   :  { %394 = vrot.lane.b32.xlu1 %v3568_v2, %s3496_s10  ;;  %392 = vrot.lane.b32.xlu0 %v3556_v0, %s3496_s10 }
  0x32   :  { %346 = vrot.lane.b32.xlu1 %v3573_v3, %s3497_s11  ;;  %344 = vrot.lane.b32.xlu0 %v3561_v1, %s3497_s11 }
  0x36   :  { %350 = vrot.lane.b32.xlu1 %v3568_v2, %s3497_s11  ;;  %348 = vrot.lane.b32.xlu0 %v3556_v0, %s3497_s11 }
  0x3a   :  { %302 = vrot.lane.b32.xlu1 %v3573_v3, %s3498_s12  ;;  %300 = vrot.lane.b32.xlu0 %v3561_v1, %s3498_s12 }
  0x3e   :  { %306 = vrot.lane.b32.xlu1 %v3568_v2, %s3498_s12  ;;  %304 = vrot.lane.b32.xlu0 %v3556_v0, %s3498_s12 }
  0x42   :  { %258 = vrot.lane.b32.xlu1 %v3573_v3, %s3499_s13  ;;  %256 = vrot.lane.b32.xlu0 %v3561_v1, %s3499_s13 }
  0x46   :  { %262 = vrot.lane.b32.xlu1 %v3568_v2, %s3499_s13  ;;  %260 = vrot.lane.b32.xlu0 %v3556_v0, %s3499_s13 }
  0x4a   :  { %214 = vrot.lane.b32.xlu1 %v3573_v3, %s3500_s14  ;;  %212 = vrot.lane.b32.xlu0 %v3561_v1, %s3500_s14 }
  0x4e   :  { %218 = vrot.lane.b32.xlu1 %v3568_v2, %s3500_s14  ;;  %216 = vrot.lane.b32.xlu0 %v3556_v0, %s3500_s14 }
  0x52   :  { %166 = vrot.lane.b32.xlu1 %v3573_v3, %s3501_s15  ;;  %164 = vrot.lane.b32.xlu0 %v3561_v1, %s3501_s15 }
  0x56   :  { %170 = vrot.lane.b32.xlu1 %v3568_v2, %s3501_s15  ;;  %168 = vrot.lane.b32.xlu0 %v3556_v0, %s3501_s15 }
  0x5a   :  { %122 = vrot.lane.b32.xlu1 %v3573_v3, %s3502_s16  ;;  %120 = vrot.lane.b32.xlu0 %v3561_v1, %s3502_s16 }
  0x5e   :  { %126 = vrot.lane.b32.xlu1 %v3568_v2, %s3502_s16  ;;  %124 = vrot.lane.b32.xlu0 %v3556_v0, %s3502_s16 }
  0x62   :  { %78 = vrot.lane.b32.xlu1 %v3573_v3, %s3503_s17  ;;  %76 = vrot.lane.b32.xlu0 %v3561_v1, %s3503_s17 }
  0x66   :  { %82 = vrot.lane.b32.xlu1 %v3568_v2, %s3503_s17  ;;  %80 = vrot.lane.b32.xlu0 %v3556_v0, %s3503_s17 }
  0x6a   :  { %32 = vrot.lane.b32.xlu1 %v3573_v3, %s3504_s18  ;;  %30 = vrot.lane.b32.xlu0 %v3561_v1, %s3504_s18 }
  0x6e   :  { %36 = vrot.lane.b32.xlu1 %v3568_v2, %s3504_s18  ;;  %34 = vrot.lane.b32.xlu0 %v3556_v0, %s3504_s18 }
  0x72   :  { %1057 = vrot.lane.b32.xlu1 %v3573_v3, %s3505_s19  ;;  %1055 = vrot.lane.b32.xlu0 %v3561_v1, %s3505_s19 }
  0x74   :  { %v617_v12 = vpop.permute.xlu1 %616  ;;  %v613_v13 = vpop.permute.xlu0 %612 }
  0x76   :  { %1061 = vrot.lane.b32.xlu1 %v3568_v2, %s3505_s19  ;;  %1059 = vrot.lane.b32.xlu0 %v3556_v0, %s3505_s19 }
  0x78   :  { %v619_v18 = vpop.permute.xlu1 %618  ;;  %v615_v19 = vpop.permute.xlu0 %614 }
  0x79   :  { %v622_v20 = vsel %vm620_vm0, %v615_v19, %v617_v12  ;;  %v624_v21 = vsel %vm620_vm0, %v619_v18, %v613_v13  ;;  %v623_v22 = vsel %vm620_vm0, %v613_v13, %v615_v19  ;;  %v621_v23 = vsel %vm620_vm0, %v617_v12, %v619_v18  ;;  %v3403_v18 = vld [vmem:[%s4852_s1 + $0x4] ss:$8 sm:$0xf] }
  0x7a   :  { %1013 = vrot.lane.b32.xlu1 %v3573_v3, %s3506_s22  ;;  %1011 = vrot.lane.b32.xlu0 %v3561_v1, %s3506_s22  ;;  %v649_v24 = vmul.f32 %v635_v14, %v622_v20  ;;  %v651_v25 = vmul.f32 %v643_v15, %v624_v21  ;;  %v648_v26 = vmul.f32 %v631_v16, %v623_v22  ;;  %vm1019_vm0 = vcmp.lt.s32.totalorder %v3667_v6, 80 }
  0x7b   :  { %v650_v27 = vmul.f32 %v639_v17, %v621_v23  ;;  %v495_v14 = vrot.slane %v3404_v54, %v3670_v7  ;;  %v507_v16 = vrot.slane %v3404_v54, %v3676_v9  ;;  %v503_v17 = vrot.slane %v3404_v54, %v3679_v10 }
  0x7c   :  { %v571_v28 = vpop.permute.xlu1 %570  ;;  %1241 = vmatprep.subr.mxu0 %v649_v24  ;;  %1324 = vmatprep.subr.mxu1 %v651_v25  ;;  %v569_v29 = vpop.permute.xlu0 %568  ;;  %v455_v24 = vrot.slane %v3403_v18, %v3673_v8  ;;  %v459_v34 = vrot.slane %v3403_v18, %v3679_v10 }
  0x7d   :  { %1242 = vmatpush1.msra.mxu0 %v648_v26  ;;  %1325 = vmatpush1.msra.mxu1 %v650_v27  ;;  %v579_v36 = vsel %vm576_vm1, %v569_v29, %v571_v28 }
  0x7e   :  { %1017 = vrot.lane.b32.xlu1 %v3568_v2, %s3506_s22  ;;  %1015 = vrot.lane.b32.xlu0 %v3556_v0, %s3506_s22  ;;  %v604_v46 = vmul.f32 %v587_v35, %v579_v36  ;;  %v3402_v35 = vld [vmem:[%s4852_s1 + $0x3] ss:$8 sm:$0xf] }
  0x80   :  { %v575_v37 = vpop.permute.xlu1 %574  ;;  %v573_v38 = vpop.permute.xlu0 %572 }
  0x81   :  { %v580_v39 = vsel %vm576_vm1, %v575_v37, %v569_v29  ;;  %v577_v40 = vsel %vm576_vm1, %v573_v38, %v575_v37  ;;  %v578_v41 = vsel %vm576_vm1, %v571_v28, %v573_v38  ;;  %vm975_vm1 = vcmp.lt.s32.totalorder %v3667_v6, 83 }
  0x82   :  { %969 = vrot.lane.b32.xlu1 %v3573_v3, %s3507_s27  ;;  %967 = vrot.lane.b32.xlu0 %v3561_v1, %s3507_s27  ;;  %v605_v43 = vmul.f32 %v591_v31, %v578_v41  ;;  %v607_v44 = vmul.f32 %v599_v32, %v580_v39  ;;  %v606_v45 = vmul.f32 %v595_v33, %v577_v40 }
  0x83   :  { %v451_v31 = vrot.slane %v3403_v18, %v3670_v7  ;;  %v463_v33 = vrot.slane %v3403_v18, %v3676_v9  ;;  %v411_v41 = vrot.slane %v3402_v35, %v3673_v8 }
  0x84   :  { %v523_v47 = vpop.permute.xlu1 %522  ;;  %1243 = vmatprep.subr.mxu0 %v605_v43  ;;  %1326 = vmatprep.subr.mxu1 %v607_v44  ;;  %v521_v48 = vpop.permute.xlu0 %520 }
  0x85   :  { %v531_v49 = vsel %vm528_vm2, %v521_v48, %v523_v47  ;;  %1244 = vmatpush1.msra.mxu0 %v604_v46  ;;  %1327 = vmatpush1.msra.mxu1 %v606_v45 }
  0x86   :  { %973 = vrot.lane.b32.xlu1 %v3568_v2, %s3507_s27  ;;  %971 = vrot.lane.b32.xlu0 %v3556_v0, %s3507_s27  ;;  %v557_v51 = vmul.f32 %v543_v42, %v531_v49  ;;  %s3513_s27 = smov 94  }
  0x87   :  { %1245 = vmatprep.subr.mxu0 %v3573_v3  ;;  %1328 = vmatprep.subr.mxu1 %v3568_v2 }
  0x88   :  { %1246 = vmatpush1.msra.mxu0 %v3561_v1  ;;  %v527_v55 = vpop.permute.xlu1 %526  ;;  %v525_v56 = vpop.permute.xlu0 %524  ;;  %1329 = vmatpush1.msra.mxu1 %v3556_v0 }
  0x89   :  { %v532_v57 = vsel %vm528_vm2, %v527_v55, %v521_v48  ;;  %1247 = vmatprep.subr.mxu0 %v557_v51  ;;  %v529_v58 = vsel %vm528_vm2, %v525_v56, %v527_v55  ;;  %v530_v59 = vsel %vm528_vm2, %v523_v47, %v525_v56  ;;  %v407_v48 = vrot.slane %v3402_v35, %v3670_v7 }
  0x8a   :  { %925 = vrot.lane.b32.xlu1 %v3573_v3, %s3508_s30  ;;  %923 = vrot.lane.b32.xlu0 %v3561_v1, %s3508_s30  ;;  %v556_v61 = vmul.f32 %v539_v50, %v532_v57  ;;  %v559_v62 = vmul.f32 %v551_v52, %v529_v58  ;;  %v558_v63 = vmul.f32 %v547_v53, %v530_v59  ;;  %vm931_vm2 = vcmp.lt.s32.totalorder %v3667_v6, 125 }
  0x8b   :  { %v419_v50 = vrot.slane %v3402_v35, %v3676_v9  ;;  %v415_v51 = vrot.slane %v3402_v35, %v3679_v10 }
  0x8c   :  { %v479_v11 = vpop.permute.xlu1 %478  ;;  %1248 = vmatpush1.msra.mxu0 %v556_v61  ;;  %1330 = vmatprep.subr.mxu1 %v559_v62  ;;  %v477_v12 = vpop.permute.xlu0 %476  ;;  %v3401_v62 = vld [vmem:[%s4852_s1 + $0x41] ss:$8 sm:$0xf] }
  0x8d   :  { %v487_v13 = vsel %vm484_vm3, %v477_v12, %v479_v11  ;;  %1331 = vmatpush1.msra.mxu1 %v558_v63  ;;  %v367_v63 = vrot.slane %v3401_v62, %v3673_v8 }
  0x8e   :  { %929 = vrot.lane.b32.xlu1 %v3568_v2, %s3508_s30  ;;  %927 = vrot.lane.b32.xlu0 %v3556_v0, %s3508_s30  ;;  %v513_v15 = vmul.f32 %v499_v60, %v487_v13  ;;  %v363_v13 = vrot.slane %v3401_v62, %v3670_v7 }
  0x90   :  { %v483_v19 = vpop.permute.xlu1 %482  ;;  %1249 = vmatprep.subr.mxu0 %v513_v15  ;;  %v481_v20 = vpop.permute.xlu0 %480 }
  0x91   :  { %v488_v21 = vsel %vm484_vm3, %v483_v19, %v477_v12  ;;  %v485_v22 = vsel %vm484_vm3, %v481_v20, %v483_v19  ;;  %v486_v23 = vsel %vm484_vm3, %v479_v11, %v481_v20  ;;  %v375_v11 = vrot.slane %v3401_v62, %v3676_v9 }
  0x92   :  { %877 = vrot.lane.b32.xlu1 %v3573_v3, %s3509_s9  ;;  %875 = vrot.lane.b32.xlu0 %v3561_v1, %s3509_s9  ;;  %v512_v25 = vmul.f32 %v495_v14, %v488_v21  ;;  %v515_v26 = vmul.f32 %v507_v16, %v485_v22  ;;  %v514_v27 = vmul.f32 %v503_v17, %v486_v23  ;;  %vm883_vm3 = vcmp.lt.s32.totalorder %v3667_v6, 3 }
  0x93   :  { %v371_v12 = vrot.slane %v3401_v62, %v3679_v10  ;;  %v3398_v62 = vld [vmem:[%s4852_s1 + $0x24] ss:$8 sm:$0xf] }
  0x94   :  { %v435_v28 = vpop.permute.xlu1 %434  ;;  %1250 = vmatpush1.msra.mxu0 %v512_v25  ;;  %1332 = vmatprep.subr.mxu1 %v515_v26  ;;  %v433_v29 = vpop.permute.xlu0 %432  ;;  %v3400_v26 = vld [vmem:[%s4852_s1 + $0x40] ss:$8 sm:$0xf] }
  0x95   :  { %v443_v30 = vsel %vm440_vm4, %v433_v29, %v435_v28  ;;  %1333 = vmatpush1.msra.mxu1 %v514_v27  ;;  %v323_v27 = vrot.slane %v3400_v26, %v3673_v8 }
  0x96   :  { %881 = vrot.lane.b32.xlu1 %v3568_v2, %s3509_s9  ;;  %879 = vrot.lane.b32.xlu0 %v3556_v0, %s3509_s9  ;;  %v469_v32 = vmul.f32 %v455_v24, %v443_v30  ;;  %v319_v30 = vrot.slane %v3400_v26, %v3670_v7 }
  0x98   :  { %v439_v36 = vpop.permute.xlu1 %438  ;;  %1251 = vmatprep.subr.mxu0 %v469_v32  ;;  %v437_v37 = vpop.permute.xlu0 %436 }
  0x99   :  { %v444_v38 = vsel %vm440_vm4, %v439_v36, %v433_v29  ;;  %v441_v39 = vsel %vm440_vm4, %v437_v37, %v439_v36  ;;  %v442_v40 = vsel %vm440_vm4, %v435_v28, %v437_v37  ;;  %v331_v28 = vrot.slane %v3400_v26, %v3676_v9 }
  0x9a   :  { %833 = vrot.lane.b32.xlu1 %v3573_v3, %s3510_s20  ;;  %831 = vrot.lane.b32.xlu0 %v3561_v1, %s3510_s20  ;;  %v468_v42 = vmul.f32 %v451_v31, %v444_v38  ;;  %v471_v43 = vmul.f32 %v463_v33, %v441_v39  ;;  %v470_v44 = vmul.f32 %v459_v34, %v442_v40  ;;  %vm839_vm4 = vcmp.lt.s32.totalorder %v3667_v6, 45 }
  0x9b   :  { %v327_v29 = vrot.slane %v3400_v26, %v3679_v10 }
  0x9c   :  { %v391_v45 = vpop.permute.xlu1 %390  ;;  %1252 = vmatpush1.msra.mxu0 %v468_v42  ;;  %1334 = vmatprep.subr.mxu1 %v471_v43  ;;  %v389_v46 = vpop.permute.xlu0 %388  ;;  %v3399_v43 = vld [vmem:[%s4852_s1 + $0x27] ss:$8 sm:$0xf] }
  0x9d   :  { %v399_v47 = vsel %vm396_vm5, %v389_v46, %v391_v45  ;;  %1335 = vmatpush1.msra.mxu1 %v470_v44  ;;  %v1100_v44 = vld [vmem:[%s4853_s2 + $0x8] sm:$0xff] }
  0x9e   :  { %837 = vrot.lane.b32.xlu1 %v3568_v2, %s3510_s20  ;;  %835 = vrot.lane.b32.xlu0 %v3556_v0, %s3510_s20  ;;  %v425_v49 = vmul.f32 %v411_v41, %v399_v47  ;;  %v283_v47 = vrot.slane %v3399_v43, %v3679_v10 }
  0x9f   :  { %3417 = vmatprep.mubr.msk.f32.mxu0 %vm1231_vm9, %v1100_v44  ;;  %3420 = vmatprep.mubr.msk.f32.mxu1 %vm1231_vm9, %v1100_v44 }
  0xa0   :  { %v395_v52 = vpop.permute.xlu1 %394  ;;  %1253 = vmatprep.subr.mxu0 %v425_v49  ;;  %v393_v53 = vpop.permute.xlu0 %392 }
  0xa1   :  { %v400_v54 = vsel %vm396_vm5, %v395_v52, %v389_v46  ;;  %v397_v55 = vsel %vm396_vm5, %v393_v53, %v395_v52  ;;  %v398_v56 = vsel %vm396_vm5, %v391_v45, %v393_v53  ;;  %v279_v45 = vrot.slane %v3399_v43, %v3673_v8 }
  0xa2   :  { %789 = vrot.lane.b32.xlu1 %v3573_v3, %s3511_s21  ;;  %787 = vrot.lane.b32.xlu0 %v3561_v1, %s3511_s21  ;;  %v424_v57 = vmul.f32 %v407_v48, %v400_v54  ;;  %v427_v58 = vmul.f32 %v419_v50, %v397_v55  ;;  %v426_v59 = vmul.f32 %v415_v51, %v398_v56  ;;  %vm795_vm5 = vcmp.lt.s32.totalorder %v3667_v6, 48 }
  0xa3   :  { %v287_v46 = vrot.slane %v3399_v43, %v3676_v9  ;;  %v275_v48 = vrot.slane %v3399_v43, %v3670_v7 }
  0xa4   :  { %v347_v60 = vpop.permute.xlu1 %346  ;;  %1254 = vmatpush1.msra.mxu0 %v424_v57  ;;  %1336 = vmatprep.subr.mxu1 %v427_v58  ;;  %v345_v61 = vpop.permute.xlu0 %344 }
  0xa5   :  { %1337 = vmatpush1.msra.mxu1 %v426_v59  ;;  %v355_v14 = vsel %vm352_vm6, %v345_v61, %v347_v60  ;;  %v3515_v59 = vmov 0  }
  0xa6   :  { %793 = vrot.lane.b32.xlu1 %v3568_v2, %s3511_s21  ;;  %791 = vrot.lane.b32.xlu0 %v3556_v0, %s3511_s21  ;;  %v380_v23 = vmul.f32 %v363_v13, %v355_v14  ;;  %v3397_v13 = vld [vmem:[%s4852_s1 + $0x23] ss:$8 sm:$0xf]  ;;  %v231_v14 = vrot.slane %v3398_v62, %v3670_v7 }
  0xa7   :  { %3478 = vset.pattern.permute.xlu1 %v3515_v59  ;;  %3477 = vset.pattern.permute.xlu0 %v3515_v59 }
  0xa8   :  { %v351_v15 = vpop.permute.xlu1 %350  ;;  %v349_v16 = vpop.permute.xlu0 %348 }
  0xa9   :  { %v356_v17 = vsel %vm352_vm6, %v351_v15, %v345_v61  ;;  %v353_v18 = vsel %vm352_vm6, %v349_v16, %v351_v15  ;;  %v354_v19 = vsel %vm352_vm6, %v347_v60, %v349_v16  ;;  %v1214_v15 = vld [vmem:[%s4854_s3 + $0x8] sm:$0xff]  ;;  %v1215_v16 = vld [vmem:[%s4854_s3 + $0x10] sm:$0xff] }
  0xaa   :  { %746 = vrot.lane.b32.xlu1 %v3573_v3, %s3512_s24  ;;  %744 = vrot.lane.b32.xlu0 %v3561_v1, %s3512_s24  ;;  %v381_v20 = vmul.f32 %v367_v63, %v354_v19  ;;  %v383_v21 = vmul.f32 %v375_v11, %v356_v17  ;;  %v382_v22 = vmul.f32 %v371_v12, %v353_v18 }
  0xab   :  { %v235_v63 = vrot.slane %v3398_v62, %v3673_v8  ;;  %v243_v11 = vrot.slane %v3398_v62, %v3676_v9  ;;  %v239_v12 = vrot.slane %v3398_v62, %v3679_v10 }
  0xac   :  { %v303_v24 = vpop.permute.xlu1 %302  ;;  %1255 = vmatprep.subr.mxu0 %v381_v20  ;;  %1338 = vmatprep.subr.mxu1 %v383_v21  ;;  %v301_v25 = vpop.permute.xlu0 %300 }
  0xad   :  { %1256 = vmatpush1.msra.mxu0 %v380_v23  ;;  %1339 = vmatpush1.msra.mxu1 %v382_v22  ;;  %v311_v31 = vsel %vm308_vm7, %v301_v25, %v303_v24  ;;  %v187_v23 = vrot.slane %v3397_v13, %v3673_v8 }
  0xae   :  { %750 = vrot.lane.b32.xlu1 %v3568_v2, %s3512_s24  ;;  %748 = vrot.lane.b32.xlu0 %v3556_v0, %s3512_s24  ;;  %v336_v40 = vmul.f32 %v319_v30, %v311_v31  ;;  %v183_v31 = vrot.slane %v3397_v13, %v3670_v7 }
  0xb0   :  { %v307_v32 = vpop.permute.xlu1 %306  ;;  %v305_v33 = vpop.permute.xlu0 %304 }
  0xb1   :  { %v312_v34 = vsel %vm308_vm7, %v307_v32, %v301_v25  ;;  %v309_v35 = vsel %vm308_vm7, %v305_v33, %v307_v32  ;;  %v310_v36 = vsel %vm308_vm7, %v303_v24, %v305_v33  ;;  %v1213_v32 = vld [vmem:[%s4854_s3] sm:$0xff] }
  0xb2   :  { %702 = vrot.lane.b32.xlu1 %v3573_v3, %s3513_s27  ;;  %700 = vrot.lane.b32.xlu0 %v3561_v1, %s3513_s27  ;;  %v337_v37 = vmul.f32 %v323_v27, %v310_v36  ;;  %v339_v38 = vmul.f32 %v331_v28, %v312_v34  ;;  %v338_v39 = vmul.f32 %v327_v29, %v309_v35  ;;  %v3396_v36 = vld [vmem:[%s4852_s1 + $0x20] ss:$8 sm:$0xf] }
  0xb3   :  { %v195_v34 = vrot.slane %v3397_v13, %v3676_v9  ;;  %v191_v35 = vrot.slane %v3397_v13, %v3679_v10  ;;  %v3394_v13 = vld [vmem:[%s4852_s1 + $0x6] ss:$8 sm:$0xf] }
  0xb4   :  { %v259_v41 = vpop.permute.xlu1 %258  ;;  %1257 = vmatprep.subr.mxu0 %v337_v37  ;;  %1340 = vmatprep.subr.mxu1 %v339_v38  ;;  %v257_v42 = vpop.permute.xlu0 %256 }
  0xb5   :  { %1258 = vmatpush1.msra.mxu0 %v336_v40  ;;  %1341 = vmatpush1.msra.mxu1 %v338_v39  ;;  %v267_v49 = vsel %vm264_vm8, %v257_v42, %v259_v41 }
  0xb6   :  { %706 = vrot.lane.b32.xlu1 %v3568_v2, %s3513_s27  ;;  %704 = vrot.lane.b32.xlu0 %v3556_v0, %s3513_s27  ;;  %v292_v58 = vmul.f32 %v275_v48, %v267_v49  ;;  %v147_v48 = vrot.slane %v3396_v36, %v3679_v10  ;;  %v3395_v49 = vld [vmem:[%s4852_s1 + $0x7] ss:$8 sm:$0xf] }
  0xb8   :  { %v263_v50 = vpop.permute.xlu1 %262  ;;  %v261_v51 = vpop.permute.xlu0 %260 }
  0xb9   :  { %v268_v52 = vsel %vm264_vm8, %v263_v50, %v257_v42  ;;  %v265_v53 = vsel %vm264_vm8, %v261_v51, %v263_v50  ;;  %v266_v54 = vsel %vm264_vm8, %v259_v41, %v261_v51  ;;  %v143_v41 = vrot.slane %v3396_v36, %v3673_v8 }
  0xba   :  { %658 = vrot.lane.b32.xlu1 %v3573_v3, %s3514_s8  ;;  %656 = vrot.lane.b32.xlu0 %v3561_v1, %s3514_s8  ;;  %v293_v55 = vmul.f32 %v279_v45, %v266_v54  ;;  %v295_v56 = vmul.f32 %v287_v46, %v268_v52  ;;  %v294_v57 = vmul.f32 %v283_v47, %v265_v53 }
  0xbb   :  { %v139_v46 = vrot.slane %v3396_v36, %v3670_v7  ;;  %v151_v47 = vrot.slane %v3396_v36, %v3676_v9 }
  0xbc   :  { %v215_v60 = vpop.permute.xlu1 %214  ;;  %1259 = vmatprep.subr.mxu0 %v293_v55  ;;  %1342 = vmatprep.subr.mxu1 %v295_v56  ;;  %v213_v61 = vpop.permute.xlu0 %212 }
  0xbd   :  { %1260 = vmatpush1.msra.mxu0 %v292_v58  ;;  %1343 = vmatpush1.msra.mxu1 %v294_v57  ;;  %v223_v17 = vsel %vm220_vm10, %v213_v61, %v215_v60  ;;  %v99_v58 = vrot.slane %v3395_v49, %v3673_v8 }
  0xbe   :  { %662 = vrot.lane.b32.xlu1 %v3568_v2, %s3514_s8  ;;  %660 = vrot.lane.b32.xlu0 %v3556_v0, %s3514_s8  ;;  %v248_v27 = vmul.f32 %v231_v14, %v223_v17 }
  0xc0   :  { %v219_v18 = vpop.permute.xlu1 %218  ;;  %v217_v19 = vpop.permute.xlu0 %216 }
  0xc1   :  { %v224_v20 = vsel %vm220_vm10, %v219_v18, %v213_v61  ;;  %v221_v21 = vsel %vm220_vm10, %v217_v19, %v219_v18  ;;  %v222_v22 = vsel %vm220_vm10, %v215_v60, %v217_v19 }
  0xc2   :  { %v249_v24 = vmul.f32 %v235_v63, %v222_v22  ;;  %v251_v25 = vmul.f32 %v243_v11, %v224_v20  ;;  %v250_v26 = vmul.f32 %v239_v12, %v221_v21  ;;  %1223 = vperm.xlu1 %3478, %v1214_v15   ;;  %1228 = vperm.xlu0 %3477, %v1215_v16  }
  0xc3   :  { %v95_v63 = vrot.slane %v3395_v49, %v3670_v7  ;;  %v107_v11 = vrot.slane %v3395_v49, %v3676_v9  ;;  %v103_v12 = vrot.slane %v3395_v49, %v3679_v10  ;;  %v55_v22 = vrot.slane %v3394_v13, %v3673_v8 }
  0xc4   :  { %v167_v28 = vpop.permute.xlu1 %166  ;;  %1261 = vmatprep.subr.mxu0 %v249_v24  ;;  %1344 = vmatprep.subr.mxu1 %v251_v25  ;;  %v165_v29 = vpop.permute.xlu0 %164 }
  0xc5   :  { %v175_v30 = vsel %vm172_vm11, %v165_v29, %v167_v28  ;;  %1262 = vmatpush1.msra.mxu0 %v248_v27  ;;  %1345 = vmatpush1.msra.mxu1 %v250_v26  ;;  %v51_v27 = vrot.slane %v3394_v13, %v3670_v7 }
  0xc6   :  { %1263 = vmatprep.subr.mxu0 %v3573_v3  ;;  %v201_v33 = vmul.f32 %v187_v23, %v175_v30  ;;  %1346 = vmatprep.subr.mxu1 %v3568_v2 }
  0xc7   :  { %1264 = vmatpush1.msra.mxu0 %v3561_v1  ;;  %1347 = vmatpush1.msra.mxu1 %v3556_v0 }
  0xc8   :  { %v171_v37 = vpop.permute.xlu1 %170  ;;  %1265 = vmatprep.subr.mxu0 %v201_v33  ;;  %v169_v38 = vpop.permute.xlu0 %168  ;;  %1218 = vperm.xlu1 %3478, %v1213_v32  }
  0xc9   :  { %v176_v3 = vsel %vm172_vm11, %v171_v37, %v165_v29  ;;  %v173_v2 = vsel %vm172_vm11, %v169_v38, %v171_v37  ;;  %v174_v39 = vsel %vm172_vm11, %v167_v28, %v169_v38  ;;  %v63_v28 = vrot.slane %v3394_v13, %v3676_v9 }
  0xca   :  { %v200_v0 = vmul.f32 %v183_v31, %v176_v3  ;;  %v203_v1 = vmul.f32 %v195_v34, %v173_v2  ;;  %v202_v40 = vmul.f32 %v191_v35, %v174_v39  ;;  %v59_v29 = vrot.slane %v3394_v13, %v3679_v10  ;;  %v3416_v2 = vld [vmem:[%s4852_s1 + $0x47] ss:$8 sm:$0xf] }
  0xcb   :  { %v1078_v39 = vrot.slane %v3416_v2, %v3673_v8 }
  0xcc   :  { %v123_v42 = vpop.permute.xlu1 %122  ;;  %1266 = vmatpush1.msra.mxu0 %v200_v0  ;;  %1348 = vmatprep.subr.mxu1 %v203_v1  ;;  %v121_v43 = vpop.permute.xlu0 %120  ;;  %v1086_v0 = vrot.slane %v3416_v2, %v3676_v9  ;;  %v1082_v1 = vrot.slane %v3416_v2, %v3679_v10 }
  0xcd   :  { %v131_v44 = vsel %vm128_vm12, %v121_v43, %v123_v42  ;;  %1349 = vmatpush1.msra.mxu1 %v202_v40  ;;  %v1074_v40 = vrot.slane %v3416_v2, %v3670_v7 }
  0xce   :  { %v157_v45 = vmul.f32 %v143_v41, %v131_v44 }
  0xd0   :  { %v127_v50 = vpop.permute.xlu1 %126  ;;  %1267 = vmatprep.subr.mxu0 %v157_v45  ;;  %v125_v51 = vpop.permute.xlu0 %124 }
  0xd1   :  { %v132_v52 = vsel %vm128_vm12, %v127_v50, %v121_v43  ;;  %v129_v53 = vsel %vm128_vm12, %v125_v51, %v127_v50  ;;  %v130_v54 = vsel %vm128_vm12, %v123_v42, %v125_v51 }
  0xd2   :  { %v156_v55 = vmul.f32 %v139_v46, %v132_v52  ;;  %v159_v56 = vmul.f32 %v151_v47, %v129_v53  ;;  %v158_v57 = vmul.f32 %v147_v48, %v130_v54  ;;  %v3415_v53 = vld [vmem:[%s4852_s1 + $0x46] ss:$8 sm:$0xf] }
  0xd3   :  { %v1034_v54 = vrot.slane %v3415_v53, %v3673_v8 }
  0xd4   :  { %v79_v59 = vpop.permute.xlu1 %78  ;;  %1268 = vmatpush1.msra.mxu0 %v156_v55  ;;  %1350 = vmatprep.subr.mxu1 %v159_v56  ;;  %v77_v60 = vpop.permute.xlu0 %76  ;;  %v1042_v55 = vrot.slane %v3415_v53, %v3676_v9  ;;  %v1038_v56 = vrot.slane %v3415_v53, %v3679_v10 }
  0xd5   :  { %v87_v61 = vsel %vm84_vm13, %v77_v60, %v79_v59  ;;  %1351 = vmatpush1.msra.mxu1 %v158_v57  ;;  %v1030_v57 = vrot.slane %v3415_v53, %v3670_v7  ;;  %v3488_v53 = vld [vmem:[%s4851_s0 + $0x18] sm:$0xff] }
  0xd6   :  { %v113_v62 = vmul.f32 %v99_v58, %v87_v61 }
  0xd8   :  { %v83_v14 = vpop.permute.xlu1 %82  ;;  %1269 = vmatprep.subr.mxu0 %v113_v62  ;;  %v81_v15 = vpop.permute.xlu0 %80 }
  0xd9   :  { %v88_v16 = vsel %vm84_vm13, %v83_v14, %v77_v60  ;;  %v85_v17 = vsel %vm84_vm13, %v81_v15, %v83_v14  ;;  %v86_v18 = vsel %vm84_vm13, %v79_v59, %v81_v15 }
  0xda   :  { %v112_v19 = vmul.f32 %v95_v63, %v88_v16  ;;  %v115_v20 = vmul.f32 %v107_v11, %v85_v17  ;;  %v114_v21 = vmul.f32 %v103_v12, %v86_v18  ;;  %v3414_v17 = vld [vmem:[%s4852_s1 + $0x45] ss:$8 sm:$0xf] }
  0xdb   :  { %v990_v18 = vrot.slane %v3414_v17, %v3673_v8 }
  0xdc   :  { %v33_v23 = vpop.permute.xlu1 %32  ;;  %1270 = vmatpush1.msra.mxu0 %v112_v19  ;;  %1352 = vmatprep.subr.mxu1 %v115_v20  ;;  %v31_v24 = vpop.permute.xlu0 %30  ;;  %v998_v19 = vrot.slane %v3414_v17, %v3676_v9  ;;  %v994_v20 = vrot.slane %v3414_v17, %v3679_v10 }
  0xdd   :  { %v43_v25 = vsel %vm40_vm14, %v31_v24, %v33_v23  ;;  %1353 = vmatpush1.msra.mxu1 %v114_v21  ;;  %v986_v21 = vrot.slane %v3414_v17, %v3670_v7 }
  0xde   :  { %v69_v26 = vmul.f32 %v55_v22, %v43_v25 }
  0xe0   :  { %v37_v30 = vpop.permute.xlu1 %36  ;;  %1271 = vmatprep.subr.mxu0 %v69_v26  ;;  %v35_v31 = vpop.permute.xlu0 %34 }
  0xe1   :  { %v44_v32 = vsel %vm40_vm14, %v37_v30, %v31_v24  ;;  %v41_v33 = vsel %vm40_vm14, %v35_v31, %v37_v30  ;;  %v42_v34 = vsel %vm40_vm14, %v33_v23, %v35_v31 }
  0xe2   :  { %v68_v35 = vmul.f32 %v51_v27, %v44_v32  ;;  %v71_v36 = vmul.f32 %v63_v28, %v41_v33  ;;  %v70_v37 = vmul.f32 %v59_v29, %v42_v34  ;;  %v3413_v34 = vld [vmem:[%s4852_s1 + $0x26] ss:$8 sm:$0xf] }
  0xe4   :  { %v1058_v38 = vpop.permute.xlu1 %1057  ;;  %1272 = vmatpush1.msra.mxu0 %v68_v35  ;;  %1354 = vmatprep.subr.mxu1 %v71_v36  ;;  %v1056_v3 = vpop.permute.xlu0 %1055  ;;  %v946_v35 = vrot.slane %v3413_v34, %v3673_v8  ;;  %v954_v36 = vrot.slane %v3413_v34, %v3676_v9 }
  0xe5   :  { %1355 = vmatpush1.msra.mxu1 %v70_v37  ;;  %v1066_v41 = vsel %vm1063_vm15, %v1056_v3, %v1058_v38  ;;  %v950_v37 = vrot.slane %v3413_v34, %v3679_v10 }
  0xe6   :  { %v1091_v50 = vmul.f32 %v1074_v40, %v1066_v41 }
  0xe8   :  { %v1062_v42 = vpop.permute.xlu1 %1061  ;;  %v1060_v43 = vpop.permute.xlu0 %1059 }
  0xe9   :  { %v1067_v44 = vsel %vm1063_vm15, %v1062_v42, %v1056_v3  ;;  %v1064_v45 = vsel %vm1063_vm15, %v1060_v43, %v1062_v42  ;;  %v1065_v46 = vsel %vm1063_vm15, %v1058_v38, %v1060_v43  ;;  %v942_v38 = vrot.slane %v3413_v34, %v3670_v7  ;;  %v3412_v3 = vld [vmem:[%s4852_s1 + $0x21] ss:$8 sm:$0xf] }
  0xea   :  { %v1092_v47 = vmul.f32 %v1078_v39, %v1065_v46  ;;  %v1094_v48 = vmul.f32 %v1086_v0, %v1067_v44  ;;  %v1093_v49 = vmul.f32 %v1082_v1, %v1064_v45  ;;  %v898_v45 = vrot.slane %v3412_v3, %v3673_v8 }
  0xeb   :  { %vm752_vm15 = vcmp.lt.s32.totalorder %v3667_v6, 51 }
  0xec   :  { %v1014_v51 = vpop.permute.xlu1 %1013  ;;  %1283 = vmatprep.subr.mxu0 %v1092_v47  ;;  %1366 = vmatprep.subr.mxu1 %v1094_v48  ;;  %v1012_v52 = vpop.permute.xlu0 %1011 }
  0xed   :  { %1284 = vmatpush2.msra.mxu0 %v1091_v50  ;;  %1367 = vmatpush2.msra.mxu1 %v1093_v49  ;;  %v1022_v58 = vsel %vm1019_vm0, %v1012_v52, %v1014_v51  ;;  %v894_v50 = vrot.slane %v3412_v3, %v3670_v7 }
  0xee   :  { %v1047_v14 = vmul.f32 %v1030_v57, %v1022_v58  ;;  %v3490_v57 = vld [vmem:[%s4851_s0 + $0x10] sm:$0xff] }
  0xef   :  { %v3411_v58 = vld [vmem:[%s4852_s1 + $0x2] ss:$8 sm:$0xf] }
  0xf0   :  { %v1018_v59 = vpop.permute.xlu1 %1017  ;;  %v1016_v60 = vpop.permute.xlu0 %1015 }
  0xf1   :  { %v1023_v61 = vsel %vm1019_vm0, %v1018_v59, %v1012_v52  ;;  %v1020_v62 = vsel %vm1019_vm0, %v1016_v60, %v1018_v59  ;;  %v1021_v63 = vsel %vm1019_vm0, %v1014_v51, %v1016_v60  ;;  %v3487_v51 = vld [vmem:[%s4851_s0 + $0x8] sm:$0xff]  ;;  %vm708_vm0 = vcmp.lt.s32.totalorder %v3667_v6, 94 }
  0xf2   :  { %v1048_v11 = vmul.f32 %v1034_v54, %v1021_v63  ;;  %v1050_v12 = vmul.f32 %v1042_v55, %v1023_v61  ;;  %v1049_v13 = vmul.f32 %v1038_v56, %v1020_v62  ;;  %v906_v54 = vrot.slane %v3412_v3, %v3676_v9  ;;  %v3489_v56 = vld [vmem:[%s4851_s0] sm:$0xff] }
  0xf3   :  { %v902_v55 = vrot.slane %v3412_v3, %v3679_v10  ;;  %v757_v3 = vld [vmem:[%s4852_s1] ss:$8 sm:$0xf] }
  0xf4   :  { %v970_v15 = vpop.permute.xlu1 %969  ;;  %1285 = vmatprep.subr.mxu0 %v1048_v11  ;;  %1368 = vmatprep.subr.mxu1 %v1050_v12  ;;  %v968_v16 = vpop.permute.xlu0 %967 }
  0xf5   :  { %1286 = vmatpush2.msra.mxu0 %v1047_v14  ;;  %1369 = vmatpush2.msra.mxu1 %v1049_v13  ;;  %v978_v22 = vsel %vm975_vm1, %v968_v16, %v970_v15  ;;  %v854_v14 = vrot.slane %v3411_v58, %v3673_v8 }
  0xf6   :  { %v1003_v31 = vmul.f32 %v986_v21, %v978_v22  ;;  %v858_v21 = vrot.slane %v3411_v58, %v3679_v10  ;;  %v3410_v22 = vld [vmem:[%s4852_s1 + $0x1] ss:$8 sm:$0xf] }
  0xf8   :  { %v974_v23 = vpop.permute.xlu1 %973  ;;  %v972_v24 = vpop.permute.xlu0 %971 }
  0xf9   :  { %v979_v25 = vsel %vm975_vm1, %v974_v23, %v968_v16  ;;  %v976_v26 = vsel %vm975_vm1, %v972_v24, %v974_v23  ;;  %v977_v27 = vsel %vm975_vm1, %v970_v15, %v972_v24  ;;  %vm664_vm1 = vcmp.lt.s32.totalorder %v3667_v6, 96  ;;  %v3121_v6 = vld [vmem:[%s4856_s4 + $0x8] sm:$0x1] }
  0xfa   :  { %v1004_v28 = vmul.f32 %v990_v18, %v977_v27  ;;  %v1006_v29 = vmul.f32 %v998_v19, %v979_v25  ;;  %v1005_v30 = vmul.f32 %v994_v20, %v976_v26  ;;  %v850_v19 = vrot.slane %v3411_v58, %v3670_v7 }
  0xfb   :  { %v862_v20 = vrot.slane %v3411_v58, %v3676_v9 }
  0xfc   :  { %v926_v32 = vpop.permute.xlu1 %925  ;;  %1287 = vmatprep.subr.mxu0 %v1004_v28  ;;  %1370 = vmatprep.subr.mxu1 %v1006_v29  ;;  %v924_v33 = vpop.permute.xlu0 %923 }
  0xfd   :  { %1288 = vmatpush2.msra.mxu0 %v1003_v31  ;;  %1371 = vmatpush2.msra.mxu1 %v1005_v30  ;;  %v934_v2 = vsel %vm931_vm2, %v924_v33, %v926_v32  ;;  %v810_v31 = vrot.slane %v3410_v22, %v3673_v8 }
  0xfe   :  { %v959_v46 = vmul.f32 %v942_v38, %v934_v2  ;;  %v814_v38 = vrot.slane %v3410_v22, %v3679_v10 }
 0x100   :  { %v930_v39 = vpop.permute.xlu1 %929  ;;  %v928_v0 = vpop.permute.xlu0 %927 }
 0x101   :  { %v935_v1 = vsel %vm931_vm2, %v930_v39, %v924_v33  ;;  %v932_v40 = vsel %vm931_vm2, %v928_v0, %v930_v39  ;;  %v933_v41 = vsel %vm931_vm2, %v926_v32, %v928_v0 }
 0x102   :  { %v960_v42 = vmul.f32 %v946_v35, %v933_v41  ;;  %v962_v43 = vmul.f32 %v954_v36, %v935_v1  ;;  %v961_v44 = vmul.f32 %v950_v37, %v932_v40  ;;  %v806_v36 = vrot.slane %v3410_v22, %v3670_v7 }
 0x103   :  { %v818_v37 = vrot.slane %v3410_v22, %v3676_v9 }
 0x104   :  { %v878_v47 = vpop.permute.xlu1 %877  ;;  %1289 = vmatprep.subr.mxu0 %v960_v42  ;;  %1372 = vmatprep.subr.mxu1 %v962_v43  ;;  %v876_v48 = vpop.permute.xlu0 %875 }
 0x105   :  { %v886_v49 = vsel %vm883_vm3, %v876_v48, %v878_v47  ;;  %1290 = vmatpush2.msra.mxu0 %v959_v46  ;;  %1373 = vmatpush2.msra.mxu1 %v961_v44  ;;  %v766_v44 = vrot.slane %v757_v3, %v3673_v8 }
 0x106   :  { %1291 = vmatprep.subr.mxu0 %v3487_v51  ;;  %v912_v52 = vmul.f32 %v898_v45, %v886_v49  ;;  %1374 = vmatprep.subr.mxu1 %v3488_v53  ;;  %v762_v49 = vrot.slane %v757_v3, %v3670_v7  ;;  %v770_v51 = vrot.slane %v757_v3, %v3679_v10 }
 0x107   :  { %1292 = vmatpush2.msra.mxu0 %v3489_v56  ;;  %1375 = vmatpush2.msra.mxu1 %v3490_v57 }
 0x108   :  { %v882_v59 = vpop.permute.xlu1 %881  ;;  %1293 = vmatprep.subr.mxu0 %v912_v52  ;;  %v880_v60 = vpop.permute.xlu0 %879 }
 0x109   :  { %v887_v61 = vsel %vm883_vm3, %v882_v59, %v876_v48  ;;  %v884_v62 = vsel %vm883_vm3, %v880_v60, %v882_v59  ;;  %v885_v63 = vsel %vm883_vm3, %v878_v47, %v880_v60 }
 0x10a   :  { %v911_v11 = vmul.f32 %v894_v50, %v887_v61  ;;  %v914_v12 = vmul.f32 %v906_v54, %v884_v62  ;;  %v913_v13 = vmul.f32 %v902_v55, %v885_v63  ;;  %v774_v50 = vrot.slane %v757_v3, %v3676_v9  ;;  %v3409_v62 = vld [vmem:[%s4852_s1 + $0x44] ss:$8 sm:$0xf] }
 0x10b   :  { %v723_v63 = vrot.slane %v3409_v62, %v3673_v8 }
 0x10c   :  { %v834_v15 = vpop.permute.xlu1 %833  ;;  %1294 = vmatpush2.msra.mxu0 %v911_v11  ;;  %1376 = vmatprep.subr.mxu1 %v914_v12  ;;  %v832_v16 = vpop.permute.xlu0 %831  ;;  %v731_v11 = vrot.slane %v3409_v62, %v3676_v9  ;;  %v727_v12 = vrot.slane %v3409_v62, %v3679_v10 }
 0x10d   :  { %v842_v17 = vsel %vm839_vm4, %v832_v16, %v834_v15  ;;  %1377 = vmatpush2.msra.mxu1 %v913_v13  ;;  %v719_v13 = vrot.slane %v3409_v62, %v3670_v7 }
 0x10e   :  { %v868_v18 = vmul.f32 %v854_v14, %v842_v17 }
 0x110   :  { %v838_v23 = vpop.permute.xlu1 %837  ;;  %1295 = vmatprep.subr.mxu0 %v868_v18  ;;  %v836_v24 = vpop.permute.xlu0 %835 }
 0x111   :  { %v843_v25 = vsel %vm839_vm4, %v838_v23, %v832_v16  ;;  %v840_v26 = vsel %vm839_vm4, %v836_v24, %v838_v23  ;;  %v841_v27 = vsel %vm839_vm4, %v834_v15, %v836_v24 }
 0x112   :  { %v867_v28 = vmul.f32 %v850_v19, %v843_v25  ;;  %v870_v29 = vmul.f32 %v862_v20, %v840_v26  ;;  %v869_v30 = vmul.f32 %v858_v21, %v841_v27  ;;  %v3408_v26 = vld [vmem:[%s4852_s1 + $0x43] ss:$8 sm:$0xf] }
 0x113   :  { %v679_v27 = vrot.slane %v3408_v26, %v3673_v8 }
 0x114   :  { %v790_v32 = vpop.permute.xlu1 %789  ;;  %1296 = vmatpush2.msra.mxu0 %v867_v28  ;;  %1378 = vmatprep.subr.mxu1 %v870_v29  ;;  %v788_v33 = vpop.permute.xlu0 %787  ;;  %v687_v28 = vrot.slane %v3408_v26, %v3676_v9  ;;  %v683_v29 = vrot.slane %v3408_v26, %v3679_v10 }
 0x115   :  { %v798_v34 = vsel %vm795_vm5, %v788_v33, %v790_v32  ;;  %1379 = vmatpush2.msra.mxu1 %v869_v30  ;;  %v675_v30 = vrot.slane %v3408_v26, %v3670_v7 }
 0x116   :  { %v824_v35 = vmul.f32 %v810_v31, %v798_v34 }
 0x118   :  { %v794_v2 = vpop.permute.xlu1 %793  ;;  %1297 = vmatprep.subr.mxu0 %v824_v35  ;;  %v792_v39 = vpop.permute.xlu0 %791 }
 0x119   :  { %v799_v0 = vsel %vm795_vm5, %v794_v2, %v788_v33  ;;  %v796_v1 = vsel %vm795_vm5, %v792_v39, %v794_v2  ;;  %v797_v40 = vsel %vm795_vm5, %v790_v32, %v792_v39  ;;  %v1099_v39 = vld [vmem:[%s4853_s2] sm:$0xff] }
 0x11a   :  { %v823_v41 = vmul.f32 %v806_v36, %v799_v0  ;;  %v826_v42 = vmul.f32 %v818_v37, %v796_v1  ;;  %v825_v43 = vmul.f32 %v814_v38, %v797_v40  ;;  %v1102_v0 = vld [vmem:[%s4853_s2 + $0x18] sm:$0xff]  ;;  %v1101_v1 = vld [vmem:[%s4853_s2 + $0x10] sm:$0xff]  ;;  %v1104_v40 = vld [vmem:[%s4853_s2 + $0x28] sm:$0xff] }
 0x11c   :  { %v747_v45 = vpop.permute.xlu1 %746  ;;  %1298 = vmatpush2.msra.mxu0 %v823_v41  ;;  %1380 = vmatprep.subr.mxu1 %v826_v42  ;;  %v745_v46 = vpop.permute.xlu0 %744  ;;  %v1103_v41 = vld [vmem:[%s4853_s2 + $0x20] sm:$0xff] }
 0x11d   :  { %v755_v47 = vsel %vm752_vm15, %v745_v46, %v747_v45  ;;  %1381 = vmatpush2.msra.mxu1 %v825_v43 }
 0x11e   :  { %v780_v48 = vmul.f32 %v766_v44, %v755_v47 }
 0x120   :  { %v751_v52 = vpop.permute.xlu1 %750  ;;  %1299 = vmatprep.subr.mxu0 %v780_v48  ;;  %v749_v53 = vpop.permute.xlu0 %748 }
 0x121   :  { %v756_v54 = vsel %vm752_vm15, %v751_v52, %v745_v46  ;;  %v753_v55 = vsel %vm752_vm15, %v749_v53, %v751_v52  ;;  %v754_v56 = vsel %vm752_vm15, %v747_v45, %v749_v53 }
 0x122   :  { %v779_v57 = vmul.f32 %v762_v49, %v756_v54  ;;  %v782_v58 = vmul.f32 %v774_v50, %v753_v55  ;;  %v781_v59 = vmul.f32 %v770_v51, %v754_v56 }
 0x124   :  { %v703_v60 = vpop.permute.xlu1 %702  ;;  %1300 = vmatpush2.msra.mxu0 %v779_v57  ;;  %1382 = vmatprep.subr.mxu1 %v782_v58  ;;  %v701_v61 = vpop.permute.xlu0 %700 }
 0x125   :  { %1383 = vmatpush2.msra.mxu1 %v781_v59  ;;  %v711_v14 = vsel %vm708_vm0, %v701_v61, %v703_v60 }
 0x126   :  { %v736_v23 = vmul.f32 %v719_v13, %v711_v14  ;;  %v11_v13 = vstv %s4855_s5 }
 0x127   :  { %12 = vst [vmem:[#allocation3] sm:$0x1] %v11_v13 }
 0x128   :  { %v707_v15 = vpop.permute.xlu1 %706  ;;  %v705_v16 = vpop.permute.xlu0 %704 }
 0x129   :  { %v712_v17 = vsel %vm708_vm0, %v707_v15, %v701_v61  ;;  %v709_v18 = vsel %vm708_vm0, %v705_v16, %v707_v15  ;;  %v710_v19 = vsel %vm708_vm0, %v703_v60, %v705_v16 }
 0x12a   :  { %v737_v20 = vmul.f32 %v723_v63, %v710_v19  ;;  %v739_v21 = vmul.f32 %v731_v11, %v712_v17  ;;  %v738_v22 = vmul.f32 %v727_v12, %v709_v18 }
 0x12c   :  { %v659_v24 = vpop.permute.xlu1 %658  ;;  %1301 = vmatprep.subr.mxu0 %v737_v20  ;;  %1384 = vmatprep.subr.mxu1 %v739_v21  ;;  %v657_v25 = vpop.permute.xlu0 %656 }
 0x12d   :  { %1302 = vmatpush2.msra.mxu0 %v736_v23  ;;  %1385 = vmatpush2.msra.mxu1 %v738_v22  ;;  %v667_v31 = vsel %vm664_vm1, %v657_v25, %v659_v24 }
 0x12e   :  { %v692_v2 = vmul.f32 %v675_v30, %v667_v31 }
 0x130   :  { %v663_v32 = vpop.permute.xlu1 %662  ;;  %v661_v33 = vpop.permute.xlu0 %660 }
 0x131   :  { %v668_v34 = vsel %vm664_vm1, %v663_v32, %v657_v25  ;;  %v665_v35 = vsel %vm664_vm1, %v661_v33, %v663_v32  ;;  %v666_v36 = vsel %vm664_vm1, %v659_v24, %v661_v33 }
 0x132   :  { %v693_v37 = vmul.f32 %v679_v27, %v666_v36  ;;  %v695_v38 = vmul.f32 %v687_v28, %v668_v34  ;;  %v694_v3 = vmul.f32 %v683_v29, %v665_v35  ;;  %v4859_v34 = vmov 0.0  }
 0x134   :  { %1303 = vmatprep.subr.mxu0 %v693_v37  ;;  %1386 = vmatprep.subr.mxu1 %v695_v38 }
 0x135   :  { %1304 = vmatpush2.msra.mxu0 %v692_v2  ;;  %1387 = vmatpush2.msra.mxu1 %v694_v3 }
 0x136   :  { %1306 = vmatmul.mubr.f32.vlgmr.msra.gmra.mxu0 %v1099_v39  ;;  %1389 = vmatmul.mubr.f32.vlgmr.msra.gmra.mxu1 %v1099_v39 }
 0x137   :  { %3418 = vmatprep.mubr.msk.f32.mxu0 %vm1231_vm9, %v1102_v0  ;;  %3421 = vmatprep.mubr.msk.f32.mxu1 %vm1231_vm9, %v1102_v0 }
 0x13a   :  { %1312 = vmatmul.mubr.f32.gmra.mxu0 %v1101_v1  ;;  %1395 = vmatmul.mubr.f32.gmra.mxu1 %v1101_v1 }
 0x13b   :  { %3419 = vmatprep.mubr.msk.f32.mxu0 %vm1231_vm9, %v1104_v40  ;;  %3422 = vmatprep.mubr.msk.f32.mxu1 %vm1231_vm9, %v1104_v40  ;;  %vm1501_vm9 = vcmask 195584  }
 0x13d   :  { %v1224_v42 = vpop.permute.xlu1 %1223  ;;  %v1229_v17 = vpop.permute.xlu0 %1228 }
 0x13e   :  { %1318 = vmatmul.mubr.f32.gmra.mxu0 %v1103_v41  ;;  %1401 = vmatmul.mubr.f32.gmra.mxu1 %v1103_v41 }
 0x13f   :  { %1569 = vmatprep.mubr.f32.mxu0 %v4859_v34  ;;  %1640 = vmatprep.mubr.f32.mxu1 %v4859_v34 }
 0x143   :  { %v1219_v43 = vpop.permute.xlu1 %1218 }
 0x1f6   :  { %v1307_v44 = vpop.f32.mrf.mxu0  ;;  %v1390_v45 = vpop.f32.mrf.mxu1 }
 0x1f7   :  { %v1308_v46 = vadd.f32 %v1307_v44, %v1219_v43  ;;  %v1391_v50 = vadd.f32 %v1390_v45, %v1219_v43 }
 0x1f8   :  { %v1309_v47 = vpop.f32.mrf.mxu0  ;;  %v1392_v48 = vpop.f32.mrf.mxu1 }
 0x1f9   :  { %v4092_v49 = vmax.f32 %v1308_v46, 0.0  ;;  %v1310_v51 = vadd.f32 %v1309_v47, %v1219_v43  ;;  %v1393_v53 = vadd.f32 %v1392_v48, %v1219_v43  ;;  %v4098_v54 = vmax.f32 %v1391_v50, 0.0 }
 0x1fa   :  { %v1313_v56 = vpop.f32.mrf.mxu0  ;;  %v1396_v57 = vpop.f32.mrf.mxu1 }
 0x1fb   :  { %4873 = vst [vmem:[#allocation5_spill] sm:$0xff] %v4092_v49  ;;  %v4094_v52 = vmax.f32 %v1310_v51, 0.0  ;;  %1431 = vrot.lane.b32.xlu0 %v4092_v49, %s3504_s18  ;;  %4875 = vst [vmem:[#allocation7_spill] sm:$0xff] %v4098_v54  ;;  %v4102_v55 = vmax.f32 %v1393_v53, 0.0  ;;  %v1314_v59 = vadd.f32 %v1313_v56, %v1224_v42  ;;  %v1397_v63 = vadd.f32 %v1396_v57, %v1224_v42 }
 0x1fc   :  { %v1315_v58 = vpop.f32.mrf.mxu0  ;;  %v1398_v61 = vpop.f32.mrf.mxu1 }
 0x1fd   :  { %4874 = vst [vmem:[#allocation6_spill] sm:$0xff] %v4094_v52  ;;  %1437 = vrot.lane.b32.xlu1 %v4094_v52, %s3504_s18  ;;  %4876 = vst [vmem:[#allocation8_spill] sm:$0xff] %v4102_v55  ;;  %v1316_v60 = vadd.f32 %v1315_v58, %v1224_v42  ;;  %v4154_v62 = vmax.f32 %v1314_v59, 0.0  ;;  %v1399_v12 = vadd.f32 %v1398_v61, %v1224_v42  ;;  %v4165_v14 = vmax.f32 %v1397_v63, 0.0 }
 0x1fe   :  { %v1319_v16 = vpop.f32.mrf.mxu0  ;;  %v1402_v20 = vpop.f32.mrf.mxu1 }
 0x1ff   :  { %1443 = vrot.lane.b32.xlu0 %v4098_v54, %s3504_s18  ;;  %4877 = vst [vmem:[#allocation9_spill] sm:$0xff] %v4154_v62  ;;  %v4158_v11 = vmax.f32 %v1316_v60, 0.0  ;;  %4878 = vst [vmem:[#allocation10_spill] sm:$0xff] %v4165_v14  ;;  %v4169_v15 = vmax.f32 %v1399_v12, 0.0  ;;  %v1320_v18 = vadd.f32 %v1319_v16, %v1229_v17  ;;  %v1403_v22 = vadd.f32 %v1402_v20, %v1229_v17 }
 0x200   :  { %v1321_v21 = vpop.f32.mrf.mxu0  ;;  %v1404_v26 = vpop.f32.mrf.mxu1 }
 0x201   :  { %1449 = vrot.lane.b32.xlu1 %v4102_v55, %s3504_s18  ;;  %4879 = vst [vmem:[#allocation11_spill] sm:$0xff] %v4169_v15  ;;  %v4223_v19 = vmax.f32 %v1320_v18, 0.0  ;;  %v1322_v24 = vadd.f32 %v1321_v21, %v1229_v17  ;;  %v4235_v28 = vmax.f32 %v1403_v22, 0.0  ;;  %v1405_v32 = vadd.f32 %v1404_v26, %v1229_v17 }
 0x203   :  { %1652 = vrot.lane.b32.xlu0 %v4092_v49, %s3503_s17  ;;  %v4243_v31 = vmax.f32 %v1322_v24, 0.0  ;;  %v4259_v38 = vmax.f32 %v1405_v32, 0.0 }
 0x205   :  { %1658 = vrot.lane.b32.xlu1 %v4094_v52, %s3503_s17 }
 0x207   :  { %1664 = vrot.lane.b32.xlu0 %v4098_v54, %s3503_s17 }
 0x209   :  { %1670 = vrot.lane.b32.xlu1 %v4102_v55, %s3503_s17 }
 0x20b   :  { %1872 = vrot.lane.b32.xlu0 %v4092_v49, %s3502_s16 }
 0x20d   :  { %1878 = vrot.lane.b32.xlu1 %v4094_v52, %s3502_s16 }
 0x20f   :  { %1884 = vrot.lane.b32.xlu0 %v4098_v54, %s3502_s16 }
 0x211   :  { %1890 = vrot.lane.b32.xlu1 %v4102_v55, %s3502_s16 }
 0x213   :  { %2092 = vrot.lane.b32.xlu0 %v4092_v49, %s3501_s15 }
 0x215   :  { %2098 = vrot.lane.b32.xlu1 %v4094_v52, %s3501_s15 }
 0x217   :  { %2104 = vrot.lane.b32.xlu0 %v4098_v54, %s3501_s15 }
 0x219   :  { %2110 = vrot.lane.b32.xlu1 %v4102_v55, %s3501_s15 }
 0x21b   :  { %2462 = vrot.lane.b32.xlu0 %v4092_v49, %s3500_s14 }
 0x21d   :  { %2468 = vrot.lane.b32.xlu1 %v4094_v52, %s3500_s14 }
 0x21f   :  { %2474 = vrot.lane.b32.xlu0 %v4098_v54, %s3500_s14 }
 0x221   :  { %2480 = vrot.lane.b32.xlu1 %v4102_v55, %s3500_s14 }
 0x223   :  { %2682 = vrot.lane.b32.xlu0 %v4092_v49, %s3499_s13 }
 0x225   :  { %2688 = vrot.lane.b32.xlu1 %v4094_v52, %s3499_s13 }
 0x227   :  { %2694 = vrot.lane.b32.xlu0 %v4098_v54, %s3499_s13 }
 0x229   :  { %2700 = vrot.lane.b32.xlu1 %v4102_v55, %s3499_s13 }
 0x22b   :  { %2902 = vrot.lane.b32.xlu0 %v4092_v49, %s3498_s12 }
 0x22d   :  { %2908 = vrot.lane.b32.xlu1 %v4094_v52, %s3498_s12 }
 0x22f   :  { %2914 = vrot.lane.b32.xlu0 %v4098_v54, %s3498_s12 }
 0x231   :  { %2920 = vrot.lane.b32.xlu1 %v4102_v55, %s3498_s12 }
 0x233   :  { %1433 = vrot.lane.b32.xlu0 %v4154_v62, %s3504_s18 }
 0x235   :  { %1439 = vrot.lane.b32.xlu1 %v4158_v11, %s3504_s18 }
 0x237   :  { %1445 = vrot.lane.b32.xlu0 %v4165_v14, %s3504_s18 }
 0x239   :  { %1451 = vrot.lane.b32.xlu1 %v4169_v15, %s3504_s18 }
 0x23b   :  { %1654 = vrot.lane.b32.xlu0 %v4154_v62, %s3503_s17 }
 0x23d   :  { %1660 = vrot.lane.b32.xlu1 %v4158_v11, %s3503_s17 }
 0x23f   :  { %1666 = vrot.lane.b32.xlu0 %v4165_v14, %s3503_s17 }
 0x241   :  { %1672 = vrot.lane.b32.xlu1 %v4169_v15, %s3503_s17 }
 0x243   :  { %1874 = vrot.lane.b32.xlu0 %v4154_v62, %s3502_s16 }
 0x245   :  { %1880 = vrot.lane.b32.xlu1 %v4158_v11, %s3502_s16 }
 0x247   :  { %1886 = vrot.lane.b32.xlu0 %v4165_v14, %s3502_s16 }
 0x249   :  { %1892 = vrot.lane.b32.xlu1 %v4169_v15, %s3502_s16 }
 0x24b   :  { %2094 = vrot.lane.b32.xlu0 %v4154_v62, %s3501_s15 }
 0x24d   :  { %2100 = vrot.lane.b32.xlu1 %v4158_v11, %s3501_s15 }
 0x24f   :  { %2106 = vrot.lane.b32.xlu0 %v4165_v14, %s3501_s15 }
 0x251   :  { %2112 = vrot.lane.b32.xlu1 %v4169_v15, %s3501_s15 }
 0x253   :  { %2464 = vrot.lane.b32.xlu0 %v4154_v62, %s3500_s14 }
 0x255   :  { %2470 = vrot.lane.b32.xlu1 %v4158_v11, %s3500_s14 }
 0x257   :  { %2476 = vrot.lane.b32.xlu0 %v4165_v14, %s3500_s14 }
 0x259   :  { %2482 = vrot.lane.b32.xlu1 %v4169_v15, %s3500_s14 }
 0x25b   :  { %2684 = vrot.lane.b32.xlu0 %v4154_v62, %s3499_s13 }
 0x25d   :  { %2690 = vrot.lane.b32.xlu1 %v4158_v11, %s3499_s13 }
 0x25f   :  { %2696 = vrot.lane.b32.xlu0 %v4165_v14, %s3499_s13 }
 0x261   :  { %2702 = vrot.lane.b32.xlu1 %v4169_v15, %s3499_s13 }
 0x263   :  { %2904 = vrot.lane.b32.xlu0 %v4154_v62, %s3498_s12 }
 0x265   :  { %2910 = vrot.lane.b32.xlu1 %v4158_v11, %s3498_s12 }
 0x267   :  { %2916 = vrot.lane.b32.xlu0 %v4165_v14, %s3498_s12 }
 0x269   :  { %2922 = vrot.lane.b32.xlu1 %v4169_v15, %s3498_s12 }
 0x26b   :  { %3124 = vrot.lane.b32.xlu0 %v4154_v62, %s3497_s11 }
 0x26d   :  { %3130 = vrot.lane.b32.xlu1 %v4158_v11, %s3497_s11  ;;  %v1432_v23 = vpop.permute.xlu0 %1431 }
 0x26f   :  { %v1438_v25 = vpop.permute.xlu1 %1437  ;;  %1435 = vrot.lane.b32.xlu0 %v4223_v19, %s3504_s18 }
 0x270   :  { %v4233_v27 = vsel %vm40_vm14, %v1432_v23, %v1438_v25 }
 0x271   :  { %3142 = vrot.lane.b32.xlu1 %v4169_v15, %s3497_s11  ;;  %v1444_v29 = vpop.permute.xlu0 %1443 }
 0x272   :  { %v4241_v30 = vsel %vm40_vm14, %v1438_v25, %v1444_v29 }
 0x273   :  { %v1450_v33 = vpop.permute.xlu1 %1449  ;;  %1447 = vrot.lane.b32.xlu0 %v4235_v28, %s3504_s18 }
 0x274   :  { %v4250_v35 = vsel %vm40_vm14, %v1444_v29, %v1450_v33  ;;  %v4254_v36 = vsel %vm40_vm14, %v1450_v33, %v1432_v23 }
 0x275   :  { %1441 = vrot.lane.b32.xlu1 %v4243_v31, %s3504_s18  ;;  %v1653_v37 = vpop.permute.xlu0 %1652 }
 0x277   :  { %v1659_v3 = vpop.permute.xlu1 %1658  ;;  %1656 = vrot.lane.b32.xlu0 %v4223_v19, %s3503_s17 }
 0x278   :  { %v4265_v2 = vsel %vm84_vm13, %v1653_v37, %v1659_v3 }
 0x279   :  { %1453 = vrot.lane.b32.xlu1 %v4259_v38, %s3504_s18  ;;  %v1665_v39 = vpop.permute.xlu0 %1664 }
 0x27a   :  { %v4271_v0 = vsel %vm84_vm13, %v1659_v3, %v1665_v39 }
 0x27b   :  { %v1671_v1 = vpop.permute.xlu1 %1670  ;;  %1668 = vrot.lane.b32.xlu0 %v4235_v28, %s3503_s17 }
 0x27c   :  { %v4277_v40 = vsel %vm84_vm13, %v1665_v39, %v1671_v1  ;;  %v4281_v41 = vsel %vm84_vm13, %v1671_v1, %v1653_v37 }
 0x27d   :  { %1662 = vrot.lane.b32.xlu1 %v4243_v31, %s3503_s17  ;;  %v1873_v42 = vpop.permute.xlu0 %1872 }
 0x27f   :  { %v1879_v43 = vpop.permute.xlu1 %1878  ;;  %1876 = vrot.lane.b32.xlu0 %v4223_v19, %s3502_s16 }
 0x280   :  { %v4289_v44 = vsel %vm128_vm12, %v1873_v42, %v1879_v43 }
 0x281   :  { %1674 = vrot.lane.b32.xlu1 %v4259_v38, %s3503_s17  ;;  %v1885_v45 = vpop.permute.xlu0 %1884 }
 0x282   :  { %v4295_v46 = vsel %vm128_vm12, %v1879_v43, %v1885_v45 }
 0x283   :  { %v1891_v47 = vpop.permute.xlu1 %1890  ;;  %1888 = vrot.lane.b32.xlu0 %v4235_v28, %s3502_s16 }
 0x284   :  { %v4301_v48 = vsel %vm128_vm12, %v1885_v45, %v1891_v47  ;;  %v4305_v50 = vsel %vm128_vm12, %v1891_v47, %v1873_v42 }
 0x285   :  { %1882 = vrot.lane.b32.xlu1 %v4243_v31, %s3502_s16  ;;  %v2093_v51 = vpop.permute.xlu0 %2092 }
 0x287   :  { %v2099_v53 = vpop.permute.xlu1 %2098  ;;  %2096 = vrot.lane.b32.xlu0 %v4223_v19, %s3501_s15 }
 0x288   :  { %v4313_v56 = vsel %vm172_vm11, %v2093_v51, %v2099_v53 }
 0x289   :  { %1894 = vrot.lane.b32.xlu1 %v4259_v38, %s3502_s16  ;;  %v2105_v57 = vpop.permute.xlu0 %2104 }
 0x28a   :  { %v4319_v58 = vsel %vm172_vm11, %v2099_v53, %v2105_v57 }
 0x28b   :  { %v2111_v59 = vpop.permute.xlu1 %2110  ;;  %2108 = vrot.lane.b32.xlu0 %v4235_v28, %s3501_s15 }
 0x28c   :  { %v4325_v60 = vsel %vm172_vm11, %v2105_v57, %v2111_v59  ;;  %v4329_v61 = vsel %vm172_vm11, %v2111_v59, %v2093_v51 }
 0x28d   :  { %2102 = vrot.lane.b32.xlu1 %v4243_v31, %s3501_s15  ;;  %v2463_v63 = vpop.permute.xlu0 %2462 }
 0x28f   :  { %v2469_v12 = vpop.permute.xlu1 %2468  ;;  %2466 = vrot.lane.b32.xlu0 %v4223_v19, %s3500_s14 }
 0x290   :  { %v4337_v13 = vsel %vm220_vm10, %v2463_v63, %v2469_v12 }
 0x291   :  { %4880 = vst [vmem:[#allocation12_spill] sm:$0xff] %v4337_v13  ;;  %2114 = vrot.lane.b32.xlu1 %v4259_v38, %s3501_s15  ;;  %v2475_v16 = vpop.permute.xlu0 %2474 }
 0x292   :  { %v4343_v17 = vsel %vm220_vm10, %v2469_v12, %v2475_v16 }
 0x293   :  { %4881 = vst [vmem:[#allocation13_spill] sm:$0xff] %v4343_v17  ;;  %v2481_v18 = vpop.permute.xlu1 %2480  ;;  %2478 = vrot.lane.b32.xlu0 %v4235_v28, %s3500_s14 }
 0x294   :  { %v4349_v20 = vsel %vm220_vm10, %v2475_v16, %v2481_v18  ;;  %v4353_v21 = vsel %vm220_vm10, %v2481_v18, %v2463_v63 }
 0x295   :  { %4882 = vst [vmem:[#allocation14_spill] sm:$0xff] %v4349_v20  ;;  %4883 = vst [vmem:[#allocation15_spill] sm:$0xff] %v4353_v21  ;;  %2472 = vrot.lane.b32.xlu1 %v4243_v31, %s3500_s14  ;;  %v2683_v22 = vpop.permute.xlu0 %2682 }
 0x297   :  { %v2689_v23 = vpop.permute.xlu1 %2688  ;;  %2686 = vrot.lane.b32.xlu0 %v4223_v19, %s3499_s13 }
 0x298   :  { %v4361_v24 = vsel %vm264_vm8, %v2683_v22, %v2689_v23 }
 0x299   :  { %4884 = vst [vmem:[#allocation16_spill] sm:$0xff] %v4361_v24  ;;  %2484 = vrot.lane.b32.xlu1 %v4259_v38, %s3500_s14  ;;  %v2695_v25 = vpop.permute.xlu0 %2694 }
 0x29a   :  { %v4367_v26 = vsel %vm264_vm8, %v2689_v23, %v2695_v25 }
 0x29b   :  { %4885 = vst [vmem:[#allocation17_spill] sm:$0xff] %v4367_v26  ;;  %v2701_v29 = vpop.permute.xlu1 %2700  ;;  %2698 = vrot.lane.b32.xlu0 %v4235_v28, %s3499_s13 }
 0x29c   :  { %v4373_v32 = vsel %vm264_vm8, %v2695_v25, %v2701_v29  ;;  %v4377_v33 = vsel %vm264_vm8, %v2701_v29, %v2683_v22 }
 0x29d   :  { %4886 = vst [vmem:[#allocation18_spill] sm:$0xff] %v4373_v32  ;;  %4887 = vst [vmem:[#allocation19_spill] sm:$0xff] %v4377_v33  ;;  %2692 = vrot.lane.b32.xlu1 %v4243_v31, %s3499_s13  ;;  %v2903_v37 = vpop.permute.xlu0 %2902 }
 0x29f   :  { %v2909_v3 = vpop.permute.xlu1 %2908  ;;  %2906 = vrot.lane.b32.xlu0 %v4223_v19, %s3498_s12 }
 0x2a0   :  { %v4385_v39 = vsel %vm308_vm7, %v2903_v37, %v2909_v3 }
 0x2a1   :  { %4888 = vst [vmem:[#allocation20_spill] sm:$0xff] %v4385_v39  ;;  %2704 = vrot.lane.b32.xlu1 %v4259_v38, %s3499_s13  ;;  %v2915_v1 = vpop.permute.xlu0 %2914 }
 0x2a2   :  { %v4391_v42 = vsel %vm308_vm7, %v2909_v3, %v2915_v1 }
 0x2a3   :  { %4889 = vst [vmem:[#allocation21_spill] sm:$0xff] %v4391_v42  ;;  %v2921_v43 = vpop.permute.xlu1 %2920  ;;  %2918 = vrot.lane.b32.xlu0 %v4235_v28, %s3498_s12 }
 0x2a4   :  { %v4397_v45 = vsel %vm308_vm7, %v2915_v1, %v2921_v43  ;;  %v4401_v47 = vsel %vm308_vm7, %v2921_v43, %v2903_v37 }
 0x2a5   :  { %4890 = vst [vmem:[#allocation22_spill] sm:$0xff] %v4397_v45  ;;  %4891 = vst [vmem:[#allocation23_spill] sm:$0xff] %v4401_v47  ;;  %2912 = vrot.lane.b32.xlu1 %v4243_v31, %s3498_s12  ;;  %v1434_v51 = vpop.permute.xlu0 %1433 }
 0x2a7   :  { %v1440_v53 = vpop.permute.xlu1 %1439  ;;  %3126 = vrot.lane.b32.xlu0 %v4223_v19, %s3497_s11 }
 0x2a8   :  { %v4409_v57 = vsel %vm40_vm14, %v1434_v51, %v1440_v53 }
 0x2a9   :  { %2924 = vrot.lane.b32.xlu1 %v4259_v38, %s3498_s12  ;;  %v1446_v59 = vpop.permute.xlu0 %1445 }
 0x2aa   :  { %v4415_v63 = vsel %vm40_vm14, %v1440_v53, %v1446_v59 }
 0x2ab   :  { %v1452_v12 = vpop.permute.xlu1 %1451  ;;  %3138 = vrot.lane.b32.xlu0 %v4235_v28, %s3497_s11 }
 0x2ac   :  { %v4421_v16 = vsel %vm40_vm14, %v1446_v59, %v1452_v12  ;;  %v4425_v18 = vsel %vm40_vm14, %v1452_v12, %v1434_v51  ;;  %v1419_v12 = vld [vmem:[#allocation3] sm:$0x1] }
 0x2ad   :  { %3132 = vrot.lane.b32.xlu1 %v4243_v31, %s3497_s11  ;;  %v1655_v22 = vpop.permute.xlu0 %1654 }
 0x2af   :  { %v1661_v23 = vpop.permute.xlu1 %1660  ;;  %3136 = vrot.lane.b32.xlu0 %v4165_v14, %s3497_s11 }
 0x2b0   :  { %v4433_v25 = vsel %vm84_vm13, %v1655_v22, %v1661_v23 }
 0x2b1   :  { %3144 = vrot.lane.b32.xlu1 %v4259_v38, %s3497_s11  ;;  %v1667_v29 = vpop.permute.xlu0 %1666 }
 0x2b2   :  { %v4439_v37 = vsel %vm84_vm13, %v1661_v23, %v1667_v29 }
 0x2b3   :  { %v1673_v3 = vpop.permute.xlu1 %1672  ;;  %3122 = vrot.lane.b32.xlu0 %v4092_v49, %s3497_s11 }
 0x2b4   :  { %v4445_v1 = vsel %vm84_vm13, %v1667_v29, %v1673_v3  ;;  %v4449_v43 = vsel %vm84_vm13, %v1673_v3, %v1655_v22 }
 0x2b5   :  { %3128 = vrot.lane.b32.xlu1 %v4094_v52, %s3497_s11  ;;  %v1875_v51 = vpop.permute.xlu0 %1874 }
 0x2b7   :  { %v1881_v53 = vpop.permute.xlu1 %1880  ;;  %3134 = vrot.lane.b32.xlu0 %v4098_v54, %s3497_s11 }
 0x2b8   :  { %v4457_v59 = vsel %vm128_vm12, %v1875_v51, %v1881_v53 }
 0x2b9   :  { %3140 = vrot.lane.b32.xlu1 %v4102_v55, %s3497_s11  ;;  %v1887_v23 = vpop.permute.xlu0 %1886 }
 0x2ba   :  { %v4463_v22 = vsel %vm128_vm12, %v1881_v53, %v1887_v23 }
 0x2bb   :  { %v1893_v29 = vpop.permute.xlu1 %1892  ;;  %1422 = vperm.xlu0 %3477, %v1419_v12  }
 0x2bc   :  { %v4467_v3 = vsel %vm128_vm12, %v1887_v23, %v1893_v29  ;;  %v4471_v4 = vsel %vm128_vm12, %v1893_v29, %v1875_v51 }
 0x2bd   :  { %v2095_v34 = vpop.permute.xlu0 %2094 }
 0x2bf   :  { %v2101_v5 = vpop.permute.xlu1 %2100 }
 0x2c0   :  { %v4475_v45 = vsel %vm172_vm11, %v2095_v34, %v2101_v5 }
 0x2c1   :  { %v2107_v47 = vpop.permute.xlu0 %2106 }
 0x2c2   :  { %v4479_v53 = vsel %vm172_vm11, %v2101_v5, %v2107_v47 }
 0x2c3   :  { %v2113_v12 = vpop.permute.xlu1 %2112 }
 0x2c4   :  { %v4483_v23 = vsel %vm172_vm11, %v2107_v47, %v2113_v12  ;;  %v4487_v51 = vsel %vm172_vm11, %v2113_v12, %v2095_v34 }
 0x2c5   :  { %v2465_v29 = vpop.permute.xlu0 %2464 }
 0x2c7   :  { %v2471_v42 = vpop.permute.xlu1 %2470 }
 0x2c8   :  { %v4491_v39 = vsel %vm220_vm10, %v2465_v29, %v2471_v42 }
 0x2c9   :  { %4892 = vst [vmem:[#allocation24_spill] sm:$0xff] %v4491_v39  ;;  %v2477_v32 = vpop.permute.xlu0 %2476 }
 0x2ca   :  { %v4495_v5 = vsel %vm220_vm10, %v2471_v42, %v2477_v32 }
 0x2cb   :  { %4893 = vst [vmem:[#allocation25_spill] sm:$0xff] %v4495_v5  ;;  %v2483_v33 = vpop.permute.xlu1 %2482 }
 0x2cc   :  { %v4499_v47 = vsel %vm220_vm10, %v2477_v32, %v2483_v33  ;;  %v4503_v34 = vsel %vm220_vm10, %v2483_v33, %v2465_v29 }
 0x2cd   :  { %4894 = vst [vmem:[#allocation26_spill] sm:$0xff] %v4499_v47  ;;  %4895 = vst [vmem:[#allocation27_spill] sm:$0xff] %v4503_v34  ;;  %v2685_v12 = vpop.permute.xlu0 %2684 }
 0x2cf   :  { %v2691_v24 = vpop.permute.xlu1 %2690 }
 0x2d0   :  { %v4507_v26 = vsel %vm264_vm8, %v2685_v12, %v2691_v24 }
 0x2d1   :  { %4896 = vst [vmem:[#allocation28_spill] sm:$0xff] %v4507_v26  ;;  %v2697_v20 = vpop.permute.xlu0 %2696 }
 0x2d2   :  { %v4511_v42 = vsel %vm264_vm8, %v2691_v24, %v2697_v20 }
 0x2d3   :  { %4897 = vst [vmem:[#allocation29_spill] sm:$0xff] %v4511_v42  ;;  %v2703_v21 = vpop.permute.xlu1 %2702 }
 0x2d4   :  { %v4515_v32 = vsel %vm264_vm8, %v2697_v20, %v2703_v21  ;;  %v4519_v33 = vsel %vm264_vm8, %v2703_v21, %v2685_v12 }
 0x2d5   :  { %4898 = vst [vmem:[#allocation30_spill] sm:$0xff] %v4515_v32  ;;  %4899 = vst [vmem:[#allocation31_spill] sm:$0xff] %v4519_v33  ;;  %v2905_v29 = vpop.permute.xlu0 %2904 }
 0x2d7   :  { %v2911_v13 = vpop.permute.xlu1 %2910 }
 0x2d8   :  { %v4523_v47 = vsel %vm308_vm7, %v2905_v29, %v2911_v13 }
 0x2d9   :  { %4900 = vst [vmem:[#allocation32_spill] sm:$0xff] %v4523_v47  ;;  %v2917_v26 = vpop.permute.xlu0 %2916 }
 0x2da   :  { %v4527_v24 = vsel %vm308_vm7, %v2911_v13, %v2917_v26  ;;  %v3423_v13 = vld [vmem:[%s4852_s1 + $0x6] ss:$8 sm:$0xf] }
 0x2db   :  { %4901 = vst [vmem:[#allocation33_spill] sm:$0xff] %v4527_v24  ;;  %v2923_v42 = vpop.permute.xlu1 %2922  ;;  %v1472_v17 = vrot.slane %v3423_v13, %v3670_v7  ;;  %v1484_v34 = vrot.slane %v3423_v13, %v3676_v9 }
 0x2dc   :  { %v4531_v20 = vsel %vm308_vm7, %v2917_v26, %v2923_v42  ;;  %v4535_v21 = vsel %vm308_vm7, %v2923_v42, %v2905_v29  ;;  %v1476_v42 = vrot.slane %v3423_v13, %v3673_v8 }
 0x2dd   :  { %4902 = vst [vmem:[#allocation34_spill] sm:$0xff] %v4531_v20  ;;  %4903 = vst [vmem:[#allocation35_spill] sm:$0xff] %v4535_v21  ;;  %v4537_v12 = vpop.permute.xlu0 %3124  ;;  %v1496_v52 = vmul.f32 %v1484_v34, %v4421_v16 }
 0x2de   :  { %4904 = vst [vmem:[#allocation36_spill] sm:$0xff] %v4537_v12  ;;  %v1494_v14 = vmul.f32 %v1476_v42, %v4409_v57  ;;  %v1492_v57 = vmul.f32 %v1484_v34, %v4250_v35 }
 0x2df   :  { %v4539_v32 = vpop.permute.xlu1 %3130 }
 0x2e0   :  { %4905 = vst [vmem:[#allocation37_spill] sm:$0xff] %v4539_v32 }
 0x2e1   :  { %v1436_v33 = vpop.permute.xlu0 %1435 }
 0x2e3   :  { %v4541_v47 = vpop.permute.xlu1 %3142 }
 0x2e4   :  { %4906 = vst [vmem:[#allocation38_spill] sm:$0xff] %v4541_v47  ;;  %v4550_v26 = vsel %vm352_vm6, %v4541_v47, %v4537_v12  ;;  %v3426_v47 = vld [vmem:[%s4852_s1 + $0x7] ss:$8 sm:$0xf] }
 0x2e5   :  { %4907 = vst [vmem:[#allocation39_spill] sm:$0xff] %v4550_v26  ;;  %v1448_v20 = vpop.permute.xlu0 %1447  ;;  %v1480_v26 = vrot.slane %v3423_v13, %v3679_v10  ;;  %v1493_v13 = vmul.f32 %v1472_v17, %v4425_v18 }
 0x2e7   :  { %v1442_v29 = vpop.permute.xlu1 %1441  ;;  %v1495_v62 = vmul.f32 %v1480_v26, %v4415_v63 }
 0x2e8   :  { %v1463_v32 = vsel %vm40_vm14, %v1436_v33, %v1442_v29  ;;  %v1460_v39 = vsel %vm40_vm14, %v1442_v29, %v1448_v20 }
 0x2e9   :  { %v1498_v21 = vmul.f32 %v1476_v42, %v1463_v32  ;;  %v1657_v24 = vpop.permute.xlu0 %1656  ;;  %v1499_v29 = vmul.f32 %v1480_v26, %v1460_v39  ;;  %v1489_v39 = vmul.f32 %v1472_v17, %v4254_v36 }
 0x2eb   :  { %v1454_v5 = vpop.permute.xlu1 %1453  ;;  %1531 = vmatprep.subr.mxu0 %v1498_v21  ;;  %v1697_v21 = vrot.slane %v3426_v47, %v3673_v8 }
 0x2ec   :  { %v1457_v12 = vsel %vm40_vm14, %v1448_v20, %v1454_v5  ;;  %v1466_v32 = vsel %vm40_vm14, %v1454_v5, %v1436_v33  ;;  %v1490_v20 = vmul.f32 %v1476_v42, %v4233_v27  ;;  %v1705_v27 = vrot.slane %v3426_v47, %v3676_v9 }
 0x2ed   :  { %v1497_v54 = vmul.f32 %v1472_v17, %v1466_v32  ;;  %v1500_v55 = vmul.f32 %v1484_v34, %v1457_v12  ;;  %v1669_v49 = vpop.permute.xlu0 %1668  ;;  %v3429_v17 = vld [vmem:[%s4852_s1 + $0x20] ss:$8 sm:$0xf]  ;;  %v4908_v12 = vmov 0.0   ;;  %v1711_v32 = vmul.f32 %v1697_v21, %v4265_v2 }
 0x2ef   :  { %v1663_v15 = vpop.permute.xlu1 %1662  ;;  %1532 = vmatpush1.msra.mxu0 %v1497_v54  ;;  %1602 = vmatprep.subr.mxu1 %v1500_v55  ;;  %v1430_v54 = vld [vmem:[%s4856_s4] sm:$0x1]  ;;  %v1491_v55 = vmul.f32 %v1480_v26, %v4241_v30  ;;  %v1717_v26 = vmul.f32 %v1705_v27, %v4445_v1 }
 0x2f0   :  { %v1684_v5 = vsel %vm84_vm13, %v1657_v24, %v1663_v15  ;;  %1533 = vmatprep.subr.mxu0 %v1494_v14  ;;  %1603 = vmatpush1.msra.mxu1 %v1499_v29  ;;  %v1693_v14 = vrot.slane %v3426_v47, %v3670_v7  ;;  %v1681_v35 = vsel %vm84_vm13, %v1663_v15, %v1669_v49 }
 0x2f1   :  { %v1719_v33 = vmul.f32 %v1697_v21, %v1684_v5  ;;  %1534 = vmatpush1.msra.mxu0 %v1493_v13  ;;  %1604 = vmatprep.subr.mxu1 %v1496_v52  ;;  %v1877_v16 = vpop.permute.xlu0 %1876  ;;  %v1701_v52 = vrot.slane %v3426_v47, %v3679_v10  ;;  %v1715_v47 = vmul.f32 %v1697_v21, %v4433_v25 }
 0x2f2   :  { %1535 = vmatprep.subr.mxu0 %v1490_v20  ;;  %1605 = vmatpush1.msra.mxu1 %v1495_v62  ;;  %v1710_v13 = vmul.f32 %v1693_v14, %v4281_v41  ;;  %v1713_v20 = vmul.f32 %v1705_v27, %v4277_v40  ;;  %v1925_v21 = vrot.slane %v3429_v17, %v3676_v9 }
 0x2f3   :  { %v1675_v36 = vpop.permute.xlu1 %1674  ;;  %1536 = vmatpush1.msra.mxu0 %v1489_v39  ;;  %1606 = vmatprep.subr.mxu1 %v1492_v57  ;;  %v1720_v34 = vmul.f32 %v1701_v52, %v1681_v35  ;;  %v1716_v29 = vmul.f32 %v1701_v52, %v4439_v37  ;;  %v1712_v2 = vmul.f32 %v1701_v52, %v4271_v0  ;;  %v3432_v57 = vld [vmem:[%s4852_s1 + $0x23] ss:$8 sm:$0xf] }
 0x2f4   :  { %v1678_v30 = vsel %vm84_vm13, %v1669_v49, %v1675_v36  ;;  %v1687_v62 = vsel %vm84_vm13, %v1675_v36, %v1657_v24  ;;  %3424 = vmatmul.mubr.msk.f32.vlgmr.msra.gmra.mxu0 %vm1501_vm9, %v1430_v54  ;;  %1607 = vmatpush1.msra.mxu1 %v1491_v55  ;;  %v1917_v49 = vrot.slane %v3429_v17, %v3673_v8 }
 0x2f5   :  { %v1718_v63 = vmul.f32 %v1693_v14, %v1687_v62  ;;  %v1721_v15 = vmul.f32 %v1705_v27, %v1678_v30  ;;  %1751 = vmatprep.subr.mxu0 %v1719_v33  ;;  %3425 = vmatmul.mubr.msk.f32.vlgmr.msra.gmra.mxu1 %vm1501_vm9, %v1430_v54  ;;  %v1889_v18 = vpop.permute.xlu0 %1888  ;;  %v1714_v24 = vmul.f32 %v1693_v14, %v4449_v43  ;;  %v1651_v43 = vld [vmem:[%s4856_s4 + $0x1] sm:$0x1] }
 0x2f6   :  { %1789 = vmatprep.mubr.f32.mxu0 %v4908_v12  ;;  %1860 = vmatprep.mubr.f32.mxu1 %v4908_v12  ;;  %v1913_v37 = vrot.slane %v3429_v17, %v3670_v7  ;;  %v1921_v39 = vrot.slane %v3429_v17, %v3679_v10  ;;  %v1935_v27 = vmul.f32 %v1917_v49, %v4457_v59 }
 0x2f7   :  { %v1883_v42 = vpop.permute.xlu1 %1882  ;;  %1752 = vmatpush1.msra.mxu0 %v1718_v63  ;;  %1822 = vmatprep.subr.mxu1 %v1721_v15  ;;  %v2137_v36 = vrot.slane %v3432_v57, %v3673_v8  ;;  %v1937_v52 = vmul.f32 %v1925_v21, %v4467_v3  ;;  %v1931_v30 = vmul.f32 %v1917_v49, %v4289_v44  ;;  %v1871_v44 = vld [vmem:[%s4856_s4 + $0x2] sm:$0x1] }
 0x2f8   :  { %v1904_v25 = vsel %vm128_vm12, %v1877_v16, %v1883_v42  ;;  %1753 = vmatprep.subr.mxu0 %v1715_v47  ;;  %1823 = vmatpush1.msra.mxu1 %v1720_v34  ;;  %v1901_v41 = vsel %vm128_vm12, %v1883_v42, %v1889_v18  ;;  %v1936_v62 = vmul.f32 %v1921_v39, %v4463_v22 }
 0x2f9   :  { %v1939_v5 = vmul.f32 %v1917_v49, %v1904_v25  ;;  %1754 = vmatpush1.msra.mxu0 %v1714_v24  ;;  %1824 = vmatprep.subr.mxu1 %v1717_v26  ;;  %v2097_v1 = vpop.permute.xlu0 %2096  ;;  %v1940_v35 = vmul.f32 %v1921_v39, %v1901_v41  ;;  %v1930_v63 = vmul.f32 %v1913_v37, %v4305_v50  ;;  %v4912_v41 = vld [vmem:[#allocation10_spill] sm:$0xff] }
 0x2fa   :  { %1755 = vmatprep.subr.mxu0 %v1711_v32  ;;  %1825 = vmatpush1.msra.mxu1 %v1716_v29  ;;  %v1933_v15 = vmul.f32 %v1925_v21, %v4301_v48  ;;  %v1932_v22 = vmul.f32 %v1921_v39, %v4295_v46  ;;  %v2133_v3 = vrot.slane %v3432_v57, %v3670_v7 }
 0x2fb   :  { %v1895_v40 = vpop.permute.xlu1 %1894  ;;  %1756 = vmatpush1.msra.mxu0 %v1710_v13  ;;  %1826 = vmatprep.subr.mxu1 %v1713_v20  ;;  %v2145_v47 = vrot.slane %v3432_v57, %v3676_v9  ;;  %v2141_v34 = vrot.slane %v3432_v57, %v3679_v10  ;;  %v2155_v32 = vmul.f32 %v2137_v36, %v4475_v45 }
 0x2fc   :  { %v1898_v0 = vsel %vm128_vm12, %v1889_v18, %v1895_v40  ;;  %v1907_v33 = vsel %vm128_vm12, %v1895_v40, %v1877_v16  ;;  %3427 = vmatmul.mubr.msk.f32.vlgmr.msra.gmra.mxu0 %vm1501_vm9, %v1651_v43  ;;  %1827 = vmatpush1.msra.mxu1 %v1712_v2  ;;  %v1934_v16 = vmul.f32 %v1913_v37, %v4471_v4 }
 0x2fd   :  { %v1938_v54 = vmul.f32 %v1913_v37, %v1907_v33  ;;  %v1941_v55 = vmul.f32 %v1925_v21, %v1898_v0  ;;  %1971 = vmatprep.subr.mxu0 %v1939_v5  ;;  %3428 = vmatmul.mubr.msk.f32.vlgmr.msra.gmra.mxu1 %vm1501_vm9, %v1651_v43  ;;  %v2109_v14 = vpop.permute.xlu0 %2108  ;;  %v2154_v25 = vmul.f32 %v2133_v3, %v4487_v51  ;;  %v4910_v37 = vld [vmem:[#allocation11_spill] sm:$0xff]  ;;  %v4911_v21 = vld [vmem:[#allocation6_spill] sm:$0xff]  ;;  %v4913_v33 = vld [vmem:[#allocation5_spill] sm:$0xff] }
 0x2fe   :  { %2009 = vmatprep.mubr.f32.mxu0 %v4908_v12  ;;  %2080 = vmatprep.mubr.f32.mxu1 %v4908_v12  ;;  %v2157_v13 = vmul.f32 %v2145_v47, %v4483_v23  ;;  %v2151_v5 = vmul.f32 %v2137_v36, %v4313_v56  ;;  %v2150_v45 = vmul.f32 %v2133_v3, %v4329_v61  ;;  %v2091_v23 = vld [vmem:[%s4856_s4 + $0x3] sm:$0x1] }
 0x2ff   :  { %v2103_v17 = vpop.permute.xlu1 %2102  ;;  %1972 = vmatpush1.msra.mxu0 %v1938_v54  ;;  %2042 = vmatprep.subr.mxu1 %v1941_v55  ;;  %v2153_v43 = vmul.f32 %v2145_v47, %v4325_v60  ;;  %v2152_v51 = vmul.f32 %v2141_v34, %v4319_v58  ;;  %v3437_v58 = vld [vmem:[%s4852_s1 + $0x24] ss:$8 sm:$0xf] }
 0x300   :  { %v2124_v59 = vsel %vm172_vm11, %v2097_v1, %v2103_v17  ;;  %1973 = vmatprep.subr.mxu0 %v1935_v27  ;;  %2043 = vmatpush1.msra.mxu1 %v1940_v35  ;;  %v2121_v48 = vsel %vm172_vm11, %v2103_v17, %v2109_v14  ;;  %v2503_v39 = vrot.slane %v3437_v58, %v3670_v7  ;;  %v3440_v35 = vld [vmem:[%s4852_s1 + $0x27] ss:$8 sm:$0xf] }
 0x301   :  { %v2159_v18 = vmul.f32 %v2137_v36, %v2124_v59  ;;  %1974 = vmatpush1.msra.mxu0 %v1934_v16  ;;  %2044 = vmatprep.subr.mxu1 %v1937_v52  ;;  %v4637_v4 = vpop.permute.xlu0 %2466  ;;  %v2160_v29 = vmul.f32 %v2141_v34, %v2121_v48  ;;  %v2515_v57 = vrot.slane %v3437_v58, %v3676_v9  ;;  %v4915_v52 = vld [vmem:[#allocation7_spill] sm:$0xff]  ;;  %v4916_v17 = vld [vmem:[#allocation25_spill] sm:$0xff] }
 0x302   :  { %1975 = vmatprep.subr.mxu0 %v1931_v30  ;;  %2045 = vmatpush1.msra.mxu1 %v1936_v62  ;;  %v2511_v54 = vrot.slane %v3437_v58, %v3679_v10 }
 0x303   :  { %v2115_v50 = vpop.permute.xlu1 %2114  ;;  %1976 = vmatpush1.msra.mxu0 %v1930_v63  ;;  %2046 = vmatprep.subr.mxu1 %v1933_v15  ;;  %v4917_v63 = vld [vmem:[#allocation24_spill] sm:$0xff] }
 0x304   :  { %v2118_v49 = vsel %vm172_vm11, %v2109_v14, %v2115_v50  ;;  %v2127_v46 = vsel %vm172_vm11, %v2115_v50, %v2097_v1  ;;  %3430 = vmatmul.mubr.msk.f32.vlgmr.msra.gmra.mxu0 %vm1501_vm9, %v1871_v44  ;;  %2047 = vmatpush1.msra.mxu1 %v1932_v22  ;;  %v2156_v1 = vmul.f32 %v2141_v34, %v4479_v53  ;;  %v4909_v53 = vld [vmem:[#allocation9_spill] sm:$0xff]  ;;  %v4914_v14 = vld [vmem:[#allocation8_spill] sm:$0xff] }
 0x305   :  { %v2158_v24 = vmul.f32 %v2133_v3, %v2127_v46  ;;  %v2161_v26 = vmul.f32 %v2145_v47, %v2118_v49  ;;  %2191 = vmatprep.subr.mxu0 %v2159_v18  ;;  %3431 = vmatmul.mubr.msk.f32.vlgmr.msra.gmra.mxu1 %vm1501_vm9, %v1871_v44  ;;  %v2479_v42 = vpop.permute.xlu0 %2478  ;;  %v2524_v15 = vmul.f32 %v2503_v39, %v4917_v63  ;;  %v4918_v18 = vld [vmem:[#allocation27_spill] sm:$0xff]  ;;  %v4919_v44 = vld [vmem:[#allocation13_spill] sm:$0xff]  ;;  %v4920_v47 = vld [vmem:[#allocation26_spill] sm:$0xff] }
 0x306   :  { %2229 = vmatprep.mubr.f32.mxu0 %v4908_v12  ;;  %2300 = vmatprep.mubr.f32.mxu1 %v4908_v12  ;;  %v2723_v3 = vrot.slane %v3440_v35, %v3670_v7  ;;  %v2526_v48 = vmul.f32 %v2511_v54, %v4920_v47  ;;  %v4921_v34 = vld [vmem:[#allocation12_spill] sm:$0xff]  ;;  %v2727_v46 = vrot.slane %v3440_v35, %v3673_v8 }
 0x307   :  { %v2473_v20 = vpop.permute.xlu1 %2472  ;;  %2192 = vmatpush1.msra.mxu0 %v2158_v24  ;;  %2262 = vmatprep.subr.mxu1 %v2161_v26  ;;  %v2520_v49 = vmul.f32 %v2503_v39, %v4921_v34  ;;  %v2461_v26 = vld [vmem:[%s4856_s4 + $0x5] sm:$0x1] }
 0x308   :  { %2193 = vmatprep.subr.mxu0 %v2155_v32  ;;  %2263 = vmatpush1.msra.mxu1 %v2160_v29  ;;  %v3443_v29 = vld [vmem:[%s4852_s1 + $0x40] ss:$8 sm:$0xf] }
 0x309   :  { %2194 = vmatpush1.msra.mxu0 %v2154_v25  ;;  %2264 = vmatprep.subr.mxu1 %v2157_v13  ;;  %v4663_v2 = vpop.permute.xlu0 %2686 }
 0x30a   :  { %2195 = vmatprep.subr.mxu0 %v2151_v5  ;;  %2265 = vmatpush1.msra.mxu1 %v2156_v1  ;;  %v4923_v5 = vld [vmem:[#allocation14_spill] sm:$0xff] }
 0x30b   :  { %v2485_v56 = vpop.permute.xlu1 %2484  ;;  %2196 = vmatpush1.msra.mxu0 %v2150_v45  ;;  %2266 = vmatprep.subr.mxu1 %v2153_v43  ;;  %v2522_v1 = vmul.f32 %v2511_v54, %v4923_v5  ;;  %v2735_v45 = vrot.slane %v3440_v35, %v3676_v9 }
 0x30c   :  { %3433 = vmatmul.mubr.msk.f32.vlgmr.msra.gmra.mxu0 %vm1501_vm9, %v2091_v23  ;;  %2267 = vmatpush1.msra.mxu1 %v2152_v51  ;;  %v2488_v0 = vsel %vm220_vm10, %v2479_v42, %v2485_v56 }
 0x30d   :  { %2341 = vmatprep.subr.mxu0 %v4243_v31  ;;  %3434 = vmatmul.mubr.msk.f32.vlgmr.msra.gmra.mxu1 %vm1501_vm9, %v2091_v23  ;;  %v4672_v60 = vpop.permute.xlu0 %2698  ;;  %v2491_v31 = vsel %vm220_vm10, %v2473_v20, %v2479_v42  ;;  %v2530_v62 = vmul.f32 %v2511_v54, %v2488_v0  ;;  %v4922_v42 = vld [vmem:[#allocation15_spill] sm:$0xff]  ;;  %v2731_v23 = vrot.slane %v3440_v35, %v3679_v10  ;;  %v4928_v0 = vld [vmem:[#allocation30_spill] sm:$0xff] }
 0x30e   :  { %2342 = vmatpush1.msra.mxu0 %v4223_v19  ;;  %2412 = vmatprep.subr.mxu1 %v4259_v38  ;;  %v2311_v19 = vld [vmem:[%s4856_s4 + $0x4] sm:$0x1]  ;;  %v2507_v38 = vrot.slane %v3437_v58, %v3673_v8  ;;  %v2523_v32 = vmul.f32 %v2515_v57, %v4922_v42 }
 0x30f   :  { %2343 = vmatprep.subr.mxu0 %v4158_v11  ;;  %2413 = vmatpush1.msra.mxu1 %v4235_v28  ;;  %v2693_v61 = vpop.permute.xlu1 %2692  ;;  %v2494_v11 = vsel %vm220_vm10, %v4637_v4, %v2473_v20  ;;  %v2497_v28 = vsel %vm220_vm10, %v2485_v56, %v4637_v4  ;;  %v2527_v4 = vmul.f32 %v2515_v57, %v4918_v18  ;;  %v4934_v42 = vld [vmem:[#allocation32_spill] sm:$0xff] }
 0x310   :  { %2344 = vmatpush1.msra.mxu0 %v4909_v53  ;;  %2414 = vmatprep.subr.mxu1 %v4910_v37  ;;  %v2529_v55 = vmul.f32 %v2507_v38, %v2491_v31  ;;  %v2528_v36 = vmul.f32 %v2503_v39, %v2494_v11  ;;  %v2531_v16 = vmul.f32 %v2515_v57, %v2497_v28  ;;  %v4925_v11 = vld [vmem:[#allocation28_spill] sm:$0xff]  ;;  %v4927_v39 = vld [vmem:[#allocation17_spill] sm:$0xff] }
 0x311   :  { %2345 = vmatprep.subr.mxu0 %v4911_v21  ;;  %2415 = vmatpush1.msra.mxu1 %v4912_v41  ;;  %v4697_v40 = vpop.permute.xlu0 %2906  ;;  %v2525_v30 = vmul.f32 %v2507_v38, %v4916_v17  ;;  %v2521_v22 = vmul.f32 %v2507_v38, %v4919_v44  ;;  %v2711_v24 = vsel %vm264_vm8, %v2693_v61, %v4672_v60  ;;  %v4926_v21 = vld [vmem:[#allocation31_spill] sm:$0xff] }
 0x312   :  { %2346 = vmatpush1.msra.mxu0 %v4913_v33  ;;  %2379 = vmatprep.mubr.f32.mxu0 %v4908_v12  ;;  %v2714_v25 = vsel %vm264_vm8, %v4663_v2, %v2693_v61  ;;  %v2749_v51 = vmul.f32 %v2727_v46, %v2711_v24  ;;  %v2943_v56 = vrot.slane %v3443_v29, %v3670_v7 }
 0x313   :  { %2416 = vmatprep.subr.mxu1 %v4914_v14  ;;  %3435 = vmatmul.mubr.msk.f32.vlgmr.msra.gmra.mxu0 %vm1501_vm9, %v2311_v19  ;;  %v2705_v27 = vpop.permute.xlu1 %2704  ;;  %v2748_v58 = vmul.f32 %v2723_v3, %v2714_v25  ;;  %v2947_v31 = vrot.slane %v3443_v29, %v3673_v8  ;;  %v2955_v38 = vrot.slane %v3443_v29, %v3676_v9  ;;  %v4929_v14 = vld [vmem:[#allocation16_spill] sm:$0xff] }
 0x314   :  { %2417 = vmatpush1.msra.mxu1 %v4915_v52  ;;  %2450 = vmatprep.mubr.f32.mxu1 %v4908_v12  ;;  %v2717_v13 = vsel %vm264_vm8, %v2705_v27, %v4663_v2  ;;  %v2708_v43 = vsel %vm264_vm8, %v4672_v60, %v2705_v27  ;;  %v4924_v60 = vld [vmem:[#allocation29_spill] sm:$0xff]  ;;  %v2744_v28 = vmul.f32 %v2723_v3, %v4925_v11  ;;  %v4930_v52 = vld [vmem:[#allocation19_spill] sm:$0xff] }
 0x315   :  { %2561 = vmatprep.subr.mxu0 %v2529_v55  ;;  %3436 = vmatmul.mubr.msk.f32.vlgmr.msra.gmra.mxu1 %vm1501_vm9, %v2311_v19  ;;  %v2919_v59 = vpop.permute.xlu0 %2918  ;;  %v2751_v61 = vmul.f32 %v2735_v45, %v2717_v13  ;;  %v2745_v53 = vmul.f32 %v2727_v46, %v4924_v60  ;;  %v2750_v37 = vmul.f32 %v2731_v23, %v2708_v43  ;;  %v4936_v13 = vld [vmem:[#allocation21_spill] sm:$0xff] }
 0x316   :  { %2562 = vmatpush1.msra.mxu0 %v2528_v36  ;;  %2632 = vmatprep.subr.mxu1 %v2531_v16  ;;  %v2747_v41 = vmul.f32 %v2735_v45, %v4926_v21  ;;  %v2741_v57 = vmul.f32 %v2727_v46, %v4927_v39  ;;  %v2746_v33 = vmul.f32 %v2731_v23, %v4928_v0  ;;  %v2681_v16 = vld [vmem:[%s4856_s4 + $0x6] sm:$0x1]  ;;  %v4942_v0 = vld [vmem:[#allocation38_spill] sm:$0xff] }
 0x317   :  { %2563 = vmatprep.subr.mxu0 %v2525_v30  ;;  %2633 = vmatpush1.msra.mxu1 %v2530_v62  ;;  %v2913_v50 = vpop.permute.xlu1 %2912  ;;  %v2740_v27 = vmul.f32 %v2723_v3, %v4929_v14  ;;  %v2743_v17 = vmul.f32 %v2735_v45, %v4930_v52  ;;  %v2951_v30 = vrot.slane %v3443_v29, %v3679_v10  ;;  %v3446_v62 = vld [vmem:[%s4852_s1 + $0x41] ss:$8 sm:$0xf] }
 0x318   :  { %2564 = vmatpush1.msra.mxu0 %v2524_v15  ;;  %2634 = vmatprep.subr.mxu1 %v2527_v4  ;;  %v2931_v35 = vsel %vm308_vm7, %v2913_v50, %v2919_v59  ;;  %v2934_v63 = vsel %vm308_vm7, %v4697_v40, %v2913_v50  ;;  %v4931_v15 = vld [vmem:[#allocation18_spill] sm:$0xff]  ;;  %v4781_v47 = vrot.slane %v3446_v62, %v3670_v7  ;;  %v4932_v50 = vld [vmem:[#allocation20_spill] sm:$0xff]  ;;  %v4935_v29 = vld [vmem:[#allocation35_spill] sm:$0xff] }
 0x319   :  { %2565 = vmatprep.subr.mxu0 %v2521_v22  ;;  %2635 = vmatpush1.msra.mxu1 %v2526_v48  ;;  %v4738_v20 = vpop.permute.xlu0 %3126  ;;  %v2742_v18 = vmul.f32 %v2731_v23, %v4931_v15  ;;  %v2969_v44 = vmul.f32 %v2947_v31, %v2931_v35  ;;  %v2968_v48 = vmul.f32 %v2943_v56, %v2934_v63  ;;  %v4938_v23 = vld [vmem:[#allocation23_spill] sm:$0xff]  ;;  %v4941_v21 = vld [vmem:[#allocation36_spill] sm:$0xff] }
 0x31a   :  { %2566 = vmatpush1.msra.mxu0 %v2520_v49  ;;  %2599 = vmatprep.mubr.f32.mxu0 %v4908_v12  ;;  %v2960_v34 = vmul.f32 %v2943_v56, %v4932_v50  ;;  %v4933_v49 = vld [vmem:[#allocation33_spill] sm:$0xff]  ;;  %v3167_v24 = vrot.slane %v3446_v62, %v3673_v8  ;;  %v2967_v25 = vmul.f32 %v2955_v38, %v4935_v29 }
 0x31b   :  { %2636 = vmatprep.subr.mxu1 %v2523_v32  ;;  %3438 = vmatmul.mubr.msk.f32.vlgmr.msra.gmra.mxu0 %vm1501_vm9, %v2461_v26  ;;  %v2925_v2 = vpop.permute.xlu1 %2924  ;;  %v2965_v46 = vmul.f32 %v2947_v31, %v4933_v49  ;;  %v2964_v32 = vmul.f32 %v2943_v56, %v4934_v42  ;;  %v2961_v5 = vmul.f32 %v2947_v31, %v4936_v13 }
 0x31c   :  { %2637 = vmatpush1.msra.mxu1 %v2522_v1  ;;  %2670 = vmatprep.mubr.f32.mxu1 %v4908_v12  ;;  %v2937_v54 = vsel %vm308_vm7, %v2925_v2, %v4697_v40  ;;  %v2928_v36 = vsel %vm308_vm7, %v2919_v59, %v2925_v2  ;;  %v3175_v40 = vrot.slane %v3446_v62, %v3676_v9  ;;  %v4937_v1 = vld [vmem:[#allocation34_spill] sm:$0xff]  ;;  %v4939_v2 = vld [vmem:[#allocation37_spill] sm:$0xff] }
 0x31d   :  { %2781 = vmatprep.subr.mxu0 %v2749_v51  ;;  %3439 = vmatmul.mubr.msk.f32.vlgmr.msra.gmra.mxu1 %vm1501_vm9, %v2461_v26  ;;  %v3139_v19 = vpop.permute.xlu0 %3138  ;;  %v2971_v4 = vmul.f32 %v2955_v38, %v2937_v54  ;;  %v2970_v22 = vmul.f32 %v2951_v30, %v2928_v36  ;;  %v2966_v45 = vmul.f32 %v2951_v30, %v4937_v1  ;;  %v4943_v36 = vld [vmem:[#allocation39_spill] sm:$0xff] }
 0x31e   :  { %2782 = vmatpush1.msra.mxu0 %v2748_v58  ;;  %2852 = vmatprep.subr.mxu1 %v2751_v61  ;;  %v2963_v51 = vmul.f32 %v2955_v38, %v4938_v23  ;;  %v2901_v61 = vld [vmem:[%s4856_s4 + $0x7] sm:$0x1]  ;;  %v4940_v38 = vld [vmem:[#allocation22_spill] sm:$0xff] }
 0x31f   :  { %2783 = vmatprep.subr.mxu0 %v2745_v53  ;;  %2853 = vmatpush1.msra.mxu1 %v2750_v37  ;;  %v3133_v55 = vpop.permute.xlu1 %3132  ;;  %v3171_v53 = vrot.slane %v3446_v62, %v3679_v10  ;;  %v2962_v11 = vmul.f32 %v2951_v30, %v4940_v38 }
 0x320   :  { %2784 = vmatpush1.msra.mxu0 %v2744_v28  ;;  %2854 = vmatprep.subr.mxu1 %v2747_v41  ;;  %v3151_v9 = vsel %vm352_vm6, %v3133_v55, %v3139_v19  ;;  %v3154_v31 = vsel %vm352_vm6, %v4738_v20, %v3133_v55 }
 0x321   :  { %2785 = vmatprep.subr.mxu0 %v2741_v57  ;;  %2855 = vmatpush1.msra.mxu1 %v2746_v33  ;;  %v3137_v59 = vpop.permute.xlu0 %3136  ;;  %v3189_v60 = vmul.f32 %v3167_v24, %v3151_v9  ;;  %v3188_v57 = vmul.f32 %v4781_v47, %v3154_v31 }
 0x322   :  { %2786 = vmatpush1.msra.mxu0 %v2740_v27  ;;  %2819 = vmatprep.mubr.f32.mxu0 %v4908_v12  ;;  %v3150_v56 = vsel %vm352_vm6, %v4939_v2, %v3137_v59  ;;  %v3147_v33 = vsel %vm352_vm6, %v3137_v59, %v4942_v0 }
 0x323   :  { %2856 = vmatprep.subr.mxu1 %v2743_v17  ;;  %3441 = vmatmul.mubr.msk.f32.vlgmr.msra.gmra.mxu0 %vm1501_vm9, %v2681_v16  ;;  %v3145_v3 = vpop.permute.xlu1 %3144  ;;  %v3185_v41 = vmul.f32 %v3167_v24, %v3150_v56  ;;  %v3186_v52 = vmul.f32 %v3171_v53, %v3147_v33 }
 0x324   :  { %2857 = vmatpush1.msra.mxu1 %v2742_v18  ;;  %2890 = vmatprep.mubr.f32.mxu1 %v4908_v12  ;;  %v3157_v8 = vsel %vm352_vm6, %v3145_v3, %v4738_v20  ;;  %v3148_v58 = vsel %vm352_vm6, %v3139_v19, %v3145_v3  ;;  %v3153_v20 = vsel %vm352_vm6, %v4941_v21, %v4939_v2 }
 0x325   :  { %3001 = vmatprep.subr.mxu0 %v2969_v44  ;;  %3442 = vmatmul.mubr.msk.f32.vlgmr.msra.gmra.mxu1 %vm1501_vm9, %v2681_v16  ;;  %v3123_v26 = vpop.permute.xlu0 %3122  ;;  %v3191_v28 = vmul.f32 %v3175_v40, %v3157_v8  ;;  %v3190_v39 = vmul.f32 %v3171_v53, %v3148_v58  ;;  %v3184_v35 = vmul.f32 %v4781_v47, %v3153_v20 }
 0x326   :  { %3002 = vmatpush1.msra.mxu0 %v2968_v48  ;;  %3072 = vmatprep.subr.mxu1 %v2971_v4  ;;  %v3187_v16 = vmul.f32 %v3175_v40, %v4943_v36 }
 0x327   :  { %3003 = vmatprep.subr.mxu0 %v2965_v46  ;;  %3073 = vmatpush1.msra.mxu1 %v2970_v22  ;;  %v3129_v43 = vpop.permute.xlu1 %3128 }
 0x328   :  { %3004 = vmatpush1.msra.mxu0 %v2964_v32  ;;  %3074 = vmatprep.subr.mxu1 %v2967_v25  ;;  %v3152_v55 = vsel %vm352_vm6, %v3123_v26, %v3129_v43 }
 0x329   :  { %3005 = vmatprep.subr.mxu0 %v2961_v5  ;;  %3075 = vmatpush1.msra.mxu1 %v2966_v45  ;;  %v3135_v37 = vpop.permute.xlu0 %3134  ;;  %v3180_v30 = vmul.f32 %v4781_v47, %v3152_v55 }
 0x32a   :  { %3006 = vmatpush1.msra.mxu0 %v2960_v34  ;;  %3039 = vmatprep.mubr.f32.mxu0 %v4908_v12  ;;  %v3149_v19 = vsel %vm352_vm6, %v3129_v43, %v3135_v37 }
 0x32b   :  { %3076 = vmatprep.subr.mxu1 %v2963_v51  ;;  %3444 = vmatmul.mubr.msk.f32.vlgmr.msra.gmra.mxu0 %vm1501_vm9, %v2901_v61  ;;  %v3141_v10 = vpop.permute.xlu1 %3140  ;;  %v3181_v14 = vmul.f32 %v3167_v24, %v3149_v19 }
 0x32c   :  { %3077 = vmatpush1.msra.mxu1 %v2962_v11  ;;  %3110 = vmatprep.mubr.f32.mxu1 %v4908_v12  ;;  %v3155_v54 = vsel %vm352_vm6, %v3141_v10, %v3123_v26  ;;  %v3146_v27 = vsel %vm352_vm6, %v3135_v37, %v3141_v10 }
 0x32d   :  { %3221 = vmatprep.subr.mxu0 %v3189_v60  ;;  %3445 = vmatmul.mubr.msk.f32.vlgmr.msra.gmra.mxu1 %vm1501_vm9, %v2901_v61  ;;  %v3183_v17 = vmul.f32 %v3175_v40, %v3155_v54  ;;  %v3182_v62 = vmul.f32 %v3171_v53, %v3146_v27 }
 0x32e   :  { %3222 = vmatpush1.msra.mxu0 %v3188_v57  ;;  %3292 = vmatprep.subr.mxu1 %v3191_v28 }
 0x32f   :  { %3223 = vmatprep.subr.mxu0 %v3185_v41  ;;  %3293 = vmatpush1.msra.mxu1 %v3190_v39 }
 0x330   :  { %3224 = vmatpush1.msra.mxu0 %v3184_v35  ;;  %3294 = vmatprep.subr.mxu1 %v3187_v16 }
 0x331   :  { %3295 = vmatpush1.msra.mxu1 %v3186_v52  ;;  %3225 = vmatprep.subr.mxu0 %v3181_v14 }
 0x332   :  { %3226 = vmatpush1.msra.mxu0 %v3180_v30  ;;  %3259 = vmatprep.mubr.f32.mxu0 %v4908_v12 }
 0x333   :  { %3447 = vmatmul.mubr.msk.f32.vlgmr.msra.gmra.mxu0 %vm1501_vm9, %v3121_v6  ;;  %3296 = vmatprep.subr.mxu1 %v3183_v17 }
 0x334   :  { %3297 = vmatpush1.msra.mxu1 %v3182_v62  ;;  %3330 = vmatprep.mubr.f32.mxu1 %v4908_v12 }
 0x335   :  { %3448 = vmatmul.mubr.msk.f32.vlgmr.msra.gmra.mxu1 %vm1501_vm9, %v3121_v6 }
 0x336   :  { %v1423_v42 = vpop.permute.xlu0 %1422 }
 0x337   :  { %v1428_v9 = vrot.slane %v1423_v42, %v3670_v7 }
 0x3b4   :  { %v1571_v63 = vpop.f32.mrf.mxu0 }
 0x3b5   :  { %v1642_v59 = vpop.f32.mrf.mxu1  ;;  %v1647_v5 = vadd.f32 %v1571_v63, %v1428_v9 }
 0x3b6   :  { %v1573_v15 = vpop.f32.mrf.mxu0  ;;  %v1649_v45 = vadd.f32 %v1642_v59, %v1428_v9 }
 0x3b7   :  { %v1644_v18 = vpop.f32.mrf.mxu1  ;;  %v1648_v8 = vadd.f32 %v1573_v15, %v1428_v9 }
 0x3b8   :  { %v1650_v2 = vadd.f32 %v1644_v18, %v1428_v9  ;;  %v4945_v9 = vlaneseq }
 0x3ba   :  { %vm3365_vm6 = vcmp.lt.s32.totalorder %v4945_v9, 256 }
 0x3bc   :  { %v1791_v4 = vpop.f32.mrf.mxu0 }
 0x3bd   :  { %v1862_v44 = vpop.f32.mrf.mxu1  ;;  %v1867_v43 = vadd.f32 %v1791_v4, %v1647_v5 }
 0x3be   :  { %v1793_v22 = vpop.f32.mrf.mxu0  ;;  %v1869_v56 = vadd.f32 %v1862_v44, %v1649_v45 }
 0x3bf   :  { %v1864_v3 = vpop.f32.mrf.mxu1  ;;  %v1868_v58 = vadd.f32 %v1793_v22, %v1648_v8 }
 0x3c0   :  { %v1870_v60 = vadd.f32 %v1864_v3, %v1650_v2 }
 0x3c4   :  { %v2011_v47 = vpop.f32.mrf.mxu0 }
 0x3c5   :  { %v2082_v40 = vpop.f32.mrf.mxu1  ;;  %v2087_v61 = vadd.f32 %v2011_v47, %v1867_v43 }
 0x3c6   :  { %v2013_v48 = vpop.f32.mrf.mxu0  ;;  %v2089_v53 = vadd.f32 %v2082_v40, %v1869_v56 }
 0x3c7   :  { %v2084_v50 = vpop.f32.mrf.mxu1  ;;  %v2088_v37 = vadd.f32 %v2013_v48, %v1868_v58  ;;  %v3517_v48 = vmov 1966171168  }
 0x3c8   :  { %v2090_v28 = vadd.f32 %v2084_v50, %v1870_v60  ;;  %v3349_v50 = vunpack.c.l.s4 %v3517_v48 }
 0x3cc   :  { %v2231_v34 = vpop.f32.mrf.mxu0 }
 0x3cd   :  { %v2302_v49 = vpop.f32.mrf.mxu1  ;;  %v2307_v38 = vadd.f32 %v2231_v34, %v2087_v61  ;;  %v3350_v34 = vunpack.c.0.s8 %v3349_v50 }
 0x3ce   :  { %v2233_v46 = vpop.f32.mrf.mxu0  ;;  %v2309_v7 = vadd.f32 %v2302_v49, %v2089_v53 }
 0x3cf   :  { %v2304_v24 = vpop.f32.mrf.mxu1  ;;  %v2308_v19 = vadd.f32 %v2233_v46, %v2088_v37  ;;  %v4944_v46 = vld [vmem:[#allocation4_spill] sm:$0xff] }
 0x3d0   :  { %v2310_v39 = vadd.f32 %v2304_v24, %v2090_v28  ;;  %v3353_v24 = vsub.s32 %v3350_v34, %v4944_v46 }
 0x3d3   :  { %v2381_v26 = vpop.f32.mrf.mxu0 }
 0x3d4   :  { %v2457_v21 = vadd.f32 %v2381_v26, %v2307_v38 }
 0x3d5   :  { %v2452_v12 = vpop.f32.mrf.mxu1  ;;  %v2383_v32 = vpop.f32.mrf.mxu0 }
 0x3d6   :  { %v2459_v10 = vadd.f32 %v2452_v12, %v2309_v7  ;;  %v2458_v57 = vadd.f32 %v2383_v32, %v2308_v19 }
 0x3d7   :  { %v2454_v29 = vpop.f32.mrf.mxu1 }
 0x3d8   :  { %v2460_v54 = vadd.f32 %v2454_v29, %v2310_v39 }
 0x3db   :  { %v2601_v25 = vpop.f32.mrf.mxu0 }
 0x3dc   :  { %v2677_v0 = vadd.f32 %v2601_v25, %v2457_v21 }
 0x3dd   :  { %v2672_v13 = vpop.f32.mrf.mxu1  ;;  %v2603_v1 = vpop.f32.mrf.mxu0 }
 0x3de   :  { %v2679_v55 = vadd.f32 %v2672_v13, %v2459_v10  ;;  %v2678_v14 = vadd.f32 %v2603_v1, %v2458_v57 }
 0x3df   :  { %v2674_v23 = vpop.f32.mrf.mxu1 }
 0x3e0   :  { %v2680_v36 = vadd.f32 %v2674_v23, %v2460_v54 }
 0x3e3   :  { %v2821_v51 = vpop.f32.mrf.mxu0 }
 0x3e4   :  { %v2897_v27 = vadd.f32 %v2821_v51, %v2677_v0 }
 0x3e5   :  { %v2892_v31 = vpop.f32.mrf.mxu1  ;;  %v2823_v11 = vpop.f32.mrf.mxu0 }
 0x3e6   :  { %v2899_v16 = vadd.f32 %v2892_v31, %v2679_v55  ;;  %v2898_v52 = vadd.f32 %v2823_v11, %v2678_v14 }
 0x3e7   :  { %v2894_v20 = vpop.f32.mrf.mxu1 }
 0x3e8   :  { %v2900_v6 = vadd.f32 %v2894_v20, %v2680_v36 }
 0x3eb   :  { %v3041_v41 = vpop.f32.mrf.mxu0 }
 0x3ec   :  { %v3117_v17 = vadd.f32 %v3041_v41, %v2897_v27 }
 0x3ed   :  { %v3112_v33 = vpop.f32.mrf.mxu1  ;;  %v3043_v35 = vpop.f32.mrf.mxu0 }
 0x3ee   :  { %v3119_v63 = vadd.f32 %v3112_v33, %v2899_v16  ;;  %v3118_v59 = vadd.f32 %v3043_v35, %v2898_v52 }
 0x3ef   :  { %v3114_v30 = vpop.f32.mrf.mxu1 }
 0x3f0   :  { %v3120_v44 = vadd.f32 %v3114_v30, %v2900_v6 }
 0x3f3   :  { %v3261_v62 = vpop.f32.mrf.mxu0 }
 0x3f4   :  { %v3337_v15 = vadd.f32 %v3261_v62, %v3117_v17 }
 0x3f5   :  { %v3263_v18 = vpop.f32.mrf.mxu0  ;;  %v3332_v4 = vpop.f32.mrf.mxu1 }
 0x3f6   :  { %v3338_v22 = vadd.f32 %v3263_v18, %v3118_v59  ;;  %v3339_v3 = vadd.f32 %v3332_v4, %v3119_v63  ;;  %3479 = vtanh.f32 %v3337_v15 }
 0x3f7   :  { %v3334_v47 = vpop.f32.mrf.mxu1 }
 0x3f8   :  { %3481 = vtanh.f32 %v3338_v22  ;;  %v3340_v40 = vadd.f32 %v3334_v47, %v3120_v44 }
 0x3f9   :  { %3483 = vtanh.f32 %v3339_v3 }
 0x3fa   :  { %3485 = vtanh.f32 %v3340_v40 }
 0x403   :  { %v3480_v49 = vpop.eup %3479 }
 0x405   :  { %v3482_v26 = vpop.eup %3481 }
 0x406   :  { %v3484_v12 = vpop.eup %3483  ;;  %v3347_v42 = vcombine.low %v3480_v49, %v3482_v26 }
 0x407   :  { %v3486_v32 = vpop.eup %3485 }
 0x408   :  { %v3354_v29 = vrot.slane %v3347_v42, %v3353_v24  ;;  %v3370_v25 = vcombine.low %v3484_v12, %v3486_v32 }
 0x40a   :  { %v3361_v13 = vrot.slane %v3354_v29, %v3353_v24  ;;  %v3377_v5 = vrot.slane %v3370_v25, %v3353_v24 }
 0x40c   :  { %3367 = vst.msk [vmem:[%s4857_s6] sm:$0x3] %vm3365_vm6, %v3361_v13  ;;  %v3384_v1 = vrot.slane %v3377_v5, %v3353_v24 }
 0x40e   :  { %3449 = vst.msk [vmem:[%s4857_s6 + $0x2] sm:$0x3] %vm3365_vm6, %v3384_v1 }

</bundles_post_ra>
